<compile_context>
chip_gen: v5e
topology: v5e:2x2
jax: 0.10.0
libtpu: 0.0.40
codegen_flags: <defaults>
</compile_context>

<pallas_src>
import numpy as np
import jax
import jax.numpy as jnp
from jax import lax
from jax.experimental import pallas as pl
from jax.experimental.pallas import tpu as pltpu

BN_EPS = 1e-5
K = 4          # kernel size of every (de)conv
STRIDE = 2
PAD = 1
TAPS = K

ENC_CH = [(3, 16), (16, 32), (32, 64), (64, 128)]
DEC_CH = [(128, 64), (64, 32), (32, 16), (16, 3)]
NUM_LAYERS = len(ENC_CH) + len(DEC_CH)

N_BATCH = 2
H0 = W0 = 32
CIN0_PAD = 4                   # first-layer channels padded 3 -> 4 (lane density)
RPAD = N_BATCH * H0            # 64: padded activation rows (N * H)
CPAD = 256                     # padded activation cols (W * C), max over layers
MROWS = TAPS * CPAD            # 1024: stage-2 contraction dim


# ----------------------------------------------------------------------------
# Kernel: grid=(8,) over layers.  Per step:
#   stage 1: s1[:, i*256:(i+1)*256] = A_i @ X          (4 small MXU issues)
#   stage 2: Y = s1 @ M_stack + bias                   (one 1024-deep matmul)
#   act: ReLU (layers 0..6) kept in VMEM scratch; Tanh -> out on the last layer.
# ----------------------------------------------------------------------------
def _ae_kernel(x_ref, a_ref, m_ref, b_ref, out_ref, act_ref, s1_ref):
    l = pl.program_id(0)

    @pl.when(l == 0)
    def _():
        act_ref[...] = x_ref[...]

    x = act_ref[...]                                       # (RPAD, CPAD) f32
    for i in range(TAPS):                                  # static unroll
        s1_ref[:, i * CPAD:(i + 1) * CPAD] = jnp.dot(
            a_ref[0, i], x, preferred_element_type=jnp.float32)

    y = jnp.dot(s1_ref[...], m_ref[0],
                preferred_element_type=jnp.float32) + b_ref[0]

    act_ref[...] = jnp.maximum(y, 0.0)                     # ReLU carry

    @pl.when(l == NUM_LAYERS - 1)
    def _():
        out_ref[...] = jnp.tanh(y)                         # final Tanh


def make_forward(a_all, m_all, b_all):
    grid_spec = pltpu.PrefetchScalarGridSpec(
        num_scalar_prefetch=0,
        grid=(NUM_LAYERS,),
        in_specs=[
            pl.BlockSpec((RPAD, CPAD), lambda l: (0, 0)),                  # x (resident)
            pl.BlockSpec((1, TAPS, RPAD, RPAD), lambda l: (l, 0, 0, 0)),   # A, per layer
            pl.BlockSpec((1, MROWS, CPAD), lambda l: (l, 0, 0)),           # M_stack, per layer
            pl.BlockSpec((1, 1, CPAD), lambda l: (l, 0, 0)),               # bias, per layer
        ],
        out_specs=pl.BlockSpec((RPAD, CPAD), lambda l: (0, 0)),            # written at last step
        scratch_shapes=[
            pltpu.VMEM((RPAD, CPAD), jnp.float32),          # activation carry
            pltpu.VMEM((RPAD, MROWS), jnp.float32),         # stage-1 column blocks
        ],
    )
    fused = pl.pallas_call(
        _ae_kernel,
        out_shape=jax.ShapeDtypeStruct((RPAD, CPAD), jnp.float32),
        grid_spec=grid_spec,
        compiler_params=pltpu.CompilerParams(
            dimension_semantics=("arbitrary",),
            vmem_limit_bytes=32 * 1024 * 1024),
    )

    def forward(x_nchw):
        n, c, h, w = x_nchw.shape
        assert n == N_BATCH and h == H0 and w == W0, (n, c, h, w)
        x = jnp.transpose(x_nchw.astype(jnp.float32), (0, 2, 3, 1))        # NHWC
        x = jnp.pad(x, ((0, 0), (0, 0), (0, 0), (0, CIN0_PAD - c)))        # C: 3 -> 4
        x2d = x.reshape(n * h, w * CIN0_PAD)                               # (64, 128)
        x2d = jnp.pad(x2d, ((0, RPAD - n * h), (0, CPAD - w * CIN0_PAD)))  # (64, 256)
        y2d = fused(x2d, a_all, m_all, b_all)                              # (64, 256)
        cout = 3
        y = y2d[:n * h, :w * cout].reshape(n, h, w, cout)
        return jnp.transpose(y, (0, 3, 1, 2))                              # NHWC -> NCHW

    return forward


# ----------------------------------------------------------------------------
# Host-side (one-time) construction of the padded per-layer constant operators.
# Layout of an activation X: rows = n*H + h (block-diagonal over batch),
# cols = w*C_layout + c, zero-padded to (RPAD, CPAD).
# ----------------------------------------------------------------------------
def _pack_conv(w_oihw, scale, bias, Hin, Win, cin_lay, N):
    """Conv2d(k=4, s=2, p=1) -> per-tap row selectors A_i + stacked operator M."""
    Cout, Cin, k, _ = w_oihw.shape
    Ho = (Hin + 2 * PAD - k) // STRIDE + 1
    Wo = (Win + 2 * PAD - k) // STRIDE + 1
    A = np.zeros((TAPS, RPAD, RPAD), np.float32)
    M = np.zeros((MROWS, CPAD), np.float32)
    brow = np.zeros((1, CPAD), np.float32)
    for i in range(k):
        for n in range(N):
            for ho in range(Ho):
                h = STRIDE * ho + i - PAD
                if 0 <= h < Hin:
                    A[i, n * Ho + ho, n * Hin + h] = 1.0
        for wo in range(Wo):
            for j in range(k):
                wi = STRIDE * wo + j - PAD
                if 0 <= wi < Win:
                    blk = w_oihw[:, :, i, j].T * scale[None, :]     # (Cin, Cout)
                    r0 = i * CPAD + wi * cin_lay
                    c0 = wo * Cout
                    M[r0:r0 + Cin, c0:c0 + Cout] += blk
    brow[0, :Wo * Cout] = np.tile(bias.astype(np.float32), Wo)
    return A, M, brow


def _pack_deconv(w_iohw, scale, bias, Hin, Win, cin_lay, N):
    """ConvTranspose2d(k=4, s=2, p=1) -> per-tap row scatters A_i + stacked operator M."""
    Cin, Cout, k, _ = w_iohw.shape
    Ho = (Hin - 1) * STRIDE - 2 * PAD + k
    Wo = (Win - 1) * STRIDE - 2 * PAD + k
    A = np.zeros((TAPS, RPAD, RPAD), np.float32)
    M = np.zeros((MROWS, CPAD), np.float32)
    brow = np.zeros((1, CPAD), np.float32)
    for i in range(k):
        for n in range(N):
            for h in range(Hin):
                oh = STRIDE * h - PAD + i
                if 0 <= oh < Ho:
                    A[i, n * Ho + oh, n * Hin + h] = 1.0
        for wi in range(Win):
            for j in range(k):
                ow = STRIDE * wi - PAD + j
                if 0 <= ow < Wo:
                    blk = w_iohw[:, :, i, j] * scale[None, :]       # (Cin, Cout)
                    r0 = i * CPAD + wi * cin_lay
                    c0 = ow * Cout
                    M[r0:r0 + Cin, c0:c0 + Cout] += blk
    brow[0, :Wo * Cout] = np.tile(bias.astype(np.float32), Wo)
    return A, M, brow


def fold_params(raw, N, H0_=32, W0_=32):
    """Fold BN(eval) + bias into padded constant operators, stacked over layers."""
    A_list, M_list, b_list = [], [], []
    H, W = H0_, W0_
    cin_lay = CIN0_PAD                              # layer-0 channels padded to 4
    for (w, b, g, beta, mean, var) in raw["enc"]:
        w = np.asarray(w, np.float32)
        b = np.asarray(b, np.float32)
        scale = np.asarray(g, np.float32) / np.sqrt(np.asarray(var, np.float32) + BN_EPS)
        bias = np.asarray(beta, np.float32) + (b - np.asarray(mean, np.float32)) * scale
        A, M, brow = _pack_conv(w, scale, bias, H, W, cin_lay, N)
        A_list.append(A); M_list.append(M); b_list.append(brow)
        cin_lay = w.shape[0]                        # Cout becomes next layer's layout
        H = (H + 2 * PAD - K) // STRIDE + 1
        W = (W + 2 * PAD - K) // STRIDE + 1
    for (w, b, g, beta, mean, var) in raw["dec"]:
        w = np.asarray(w, np.float32)
        b = np.asarray(b, np.float32)
        cout = w.shape[1]
        if g is not None:
            scale = np.asarray(g, np.float32) / np.sqrt(np.asarray(var, np.float32) + BN_EPS)
            bias = np.asarray(beta, np.float32) + (b - np.asarray(mean, np.float32)) * scale
        else:                                       # last layer: bias only, Tanh in kernel
            scale = np.ones((cout,), np.float32)
            bias = b
        A, M, brow = _pack_deconv(w, scale, bias, H, W, cin_lay, N)
        A_list.append(A); M_list.append(M); b_list.append(brow)
        cin_lay = cout
        H = (H - 1) * STRIDE - 2 * PAD + K
        W = (W - 1) * STRIDE - 2 * PAD + K
    a_all = jnp.asarray(np.stack(A_list))           # (8, 4, 64, 64)
    m_all = jnp.asarray(np.stack(M_list))           # (8, 1024, 256)
    b_all = jnp.asarray(np.stack(b_list))           # (8, 1, 256)
    return a_all, m_all, b_all


# ----------------------------------------------------------------------------
# Deterministic parameter construction (mirrors module __init__ shapes).
# ----------------------------------------------------------------------------
def make_params(key):
    raw = {"enc": [], "dec": []}
    for cin, cout in ENC_CH:
        key, kw, kb = jax.random.split(key, 3)
        bound = 1.0 / (cin * K * K) ** 0.5
        w = jax.random.uniform(kw, (cout, cin, K, K), jnp.float32, -bound, bound)
        b = jax.random.uniform(kb, (cout,), jnp.float32, -bound, bound)
        gamma = jnp.ones((cout,), jnp.float32)
        beta = jnp.zeros((cout,), jnp.float32)
        mean = jnp.zeros((cout,), jnp.float32)
        var = jnp.ones((cout,), jnp.float32)
        raw["enc"].append((w, b, gamma, beta, mean, var))
    for li, (cin, cout) in enumerate(DEC_CH):
        key, kw, kb = jax.random.split(key, 3)
        bound = 1.0 / (cout * K * K) ** 0.5
        w = jax.random.uniform(kw, (cin, cout, K, K), jnp.float32, -bound, bound)
        b = jax.random.uniform(kb, (cout,), jnp.float32, -bound, bound)
        if li < 3:
            gamma = jnp.ones((cout,), jnp.float32)
            beta = jnp.zeros((cout,), jnp.float32)
            mean = jnp.zeros((cout,), jnp.float32)
            var = jnp.ones((cout,), jnp.float32)
        else:
            gamma = beta = mean = var = None
        raw["dec"].append((w, b, gamma, beta, mean, var))
    return raw


# ----------------------------------------------------------------------------
# Pure-XLA reference (matches PyTorch eval-mode semantics).
# ----------------------------------------------------------------------------
def reference_forward(x_nchw, raw):
    dn = ("NCHW", "OIHW", "NCHW")
    x = x_nchw.astype(jnp.float32)
    for (w, b, g, beta, mean, var) in raw["enc"]:
        x = lax.conv_general_dilated(x, w, (STRIDE, STRIDE), [(PAD, PAD)] * 2,
                                     dimension_numbers=dn)
        x = x + b[None, :, None, None]
        x = (x - mean[None, :, None, None]) / jnp.sqrt(var[None, :, None, None] + BN_EPS)
        x = x * g[None, :, None, None] + beta[None, :, None, None]
        x = jnp.maximum(x, 0.0)
    for li, (w, b, g, beta, mean, var) in enumerate(raw["dec"]):
        w_eq = jnp.transpose(w, (1, 0, 2, 3))[:, :, ::-1, ::-1]    # OIHW, flipped
        x = lax.conv_general_dilated(x, w_eq, (1, 1), [(K - 1 - PAD,) * 2] * 2,
                                     lhs_dilation=(STRIDE, STRIDE),
                                     dimension_numbers=dn)
        x = x + b[None, :, None, None]
        if li < 3:
            x = (x - mean[None, :, None, None]) / jnp.sqrt(var[None, :, None, None] + BN_EPS)
            x = x * g[None, :, None, None] + beta[None, :, None, None]
            x = jnp.maximum(x, 0.0)
        else:
            x = jnp.tanh(x)
    return x


if __name__ == "__main__":
    key = jax.random.PRNGKey(0)
    kx, kp = jax.random.split(key)
    x = jax.random.normal(kx, (N_BATCH, 3, 32, 32), jnp.float32)   # NCHW, like PyTorch

    raw = make_params(kp)
    a_all, m_all, b_all = fold_params(raw, N_BATCH)
    forward = make_forward(a_all, m_all, b_all)

    fwd = jax.jit(forward)
    out = jax.block_until_ready(fwd(x))

    ref = jax.block_until_ready(reference_forward(x, raw))
    assert out.shape == (N_BATCH, 3, 32, 32), out.shape
    max_err = float(jnp.max(jnp.abs(out - ref)))
    assert jnp.allclose(out, ref, rtol=1e-3, atol=1e-3), max_err

    print("KERNEL_OK")
</pallas_src>

<mosaic_0001>
module attributes {stable_mosaic.version = 11 : i64} {
  func.func @_ae_kernel(%arg0: i32, %arg1: memref<64x256xf32, #tpu.memory_space<vmem>>, %arg2: memref<1x4x64x64xf32, #tpu.memory_space<vmem>>, %arg3: memref<1x1024x256xf32, #tpu.memory_space<vmem>>, %arg4: memref<1x1x256xf32, #tpu.memory_space<vmem>>, %arg5: memref<64x256xf32, #tpu.memory_space<vmem>>, %arg6: memref<64x256xf32, #tpu.memory_space<vmem>>, %arg7: memref<64x1024xf32, #tpu.memory_space<vmem>>) attributes {dimension_semantics = [#tpu.dimension_semantics<arbitrary>], iteration_bounds = array<i64: 8>, scalar_prefetch = 0 : i64, scratch_operands = 2 : i64, tpu.core_type = #tpu.core_type<tc>, window_params = [{pipeline_mode = #tpu.pipeline_mode<synchronous>, transform_indices = @transform_0, window_bounds = array<i64: 64, 256>}, {transform_indices = @transform_1, window_bounds = array<i64: 1, 4, 64, 64>}, {transform_indices = @transform_2, window_bounds = array<i64: 1, 1024, 256>}, {transform_indices = @transform_3, window_bounds = array<i64: 1, 1, 256>}, {pipeline_mode = #tpu.pipeline_mode<synchronous>, transform_indices = @transform_4, window_bounds = array<i64: 64, 256>}]} {
    %c0_i32 = arith.constant 0 : i32
    %0 = arith.cmpi eq, %arg0, %c0_i32 : i32
    %1 = arith.extui %0 : i1 to i32
    %c0_i32_0 = arith.constant 0 : i32
    %2 = arith.cmpi ne, %1, %c0_i32_0 : i32
    scf.if %2 {
      %c0_36 = arith.constant 0 : index
      %c0_37 = arith.constant 0 : index
      %34 = vector.load %arg1[%c0_36, %c0_37] : memref<64x256xf32, #tpu.memory_space<vmem>>, vector<64x256xf32>
      %c0_38 = arith.constant 0 : index
      %c0_39 = arith.constant 0 : index
      %35 = vector.load %arg6[%c0_38, %c0_39] : memref<64x256xf32, #tpu.memory_space<vmem>>, vector<64x256xf32>
      tpu.vector_store %arg6[%c0_38, %c0_39], %34 {strides = array<i32>} : memref<64x256xf32, #tpu.memory_space<vmem>>, vector<64x256xf32>,
    } else {
    }
    %c0 = arith.constant 0 : index
    %c0_1 = arith.constant 0 : index
    %3 = vector.load %arg6[%c0, %c0_1] : memref<64x256xf32, #tpu.memory_space<vmem>>, vector<64x256xf32>
    %c0_2 = arith.constant 0 : index
    %c0_3 = arith.constant 0 : index
    %c0_4 = arith.constant 0 : index
    %c0_5 = arith.constant 0 : index
    %4 = vector.load %arg2[%c0_2, %c0_3, %c0_4, %c0_5] : memref<1x4x64x64xf32, #tpu.memory_space<vmem>>, vector<1x1x64x64xf32>
    %5 = vector.shape_cast %4 : vector<1x1x64x64xf32> to vector<64x64xf32>
    %cst = arith.constant dense<0.000000e+00> : vector<64x256xf32>
    %6 = tpu.matmul %5, %3, %cst {dimension_numbers = #tpu.dot_dimension_numbers<[1], [0], [0], [1], [0, 0, 1, 1], [], []>} : vector<64x64xf32>, vector<64x256xf32>, vector<64x256xf32> -> vector<64x256xf32>
    %c0_6 = arith.constant 0 : index
    %c0_7 = arith.constant 0 : index
    %7 = vector.load %arg7[%c0_6, %c0_7] : memref<64x1024xf32, #tpu.memory_space<vmem>>, vector<64x256xf32>
    tpu.vector_store %arg7[%c0_6, %c0_7], %6 {strides = array<i32>} : memref<64x1024xf32, #tpu.memory_space<vmem>>, vector<64x256xf32>,
    %c0_8 = arith.constant 0 : index
    %c1 = arith.constant 1 : index
    %c0_9 = arith.constant 0 : index
    %c0_10 = arith.constant 0 : index
    %8 = vector.load %arg2[%c0_8, %c1, %c0_9, %c0_10] : memref<1x4x64x64xf32, #tpu.memory_space<vmem>>, vector<1x1x64x64xf32>
    %9 = vector.shape_cast %8 : vector<1x1x64x64xf32> to vector<64x64xf32>
    %cst_11 = arith.constant dense<0.000000e+00> : vector<64x256xf32>
    %10 = tpu.matmul %9, %3, %cst_11 {dimension_numbers = #tpu.dot_dimension_numbers<[1], [0], [0], [1], [0, 0, 1, 1], [], []>} : vector<64x64xf32>, vector<64x256xf32>, vector<64x256xf32> -> vector<64x256xf32>
    %c0_12 = arith.constant 0 : index
    %c256 = arith.constant 256 : index
    %11 = vector.load %arg7[%c0_12, %c256] : memref<64x1024xf32, #tpu.memory_space<vmem>>, vector<64x256xf32>
    tpu.vector_store %arg7[%c0_12, %c256], %10 {strides = array<i32>} : memref<64x1024xf32, #tpu.memory_space<vmem>>, vector<64x256xf32>,
    %c0_13 = arith.constant 0 : index
    %c2 = arith.constant 2 : index
    %c0_14 = arith.constant 0 : index
    %c0_15 = arith.constant 0 : index
    %12 = vector.load %arg2[%c0_13, %c2, %c0_14, %c0_15] : memref<1x4x64x64xf32, #tpu.memory_space<vmem>>, vector<1x1x64x64xf32>
    %13 = vector.shape_cast %12 : vector<1x1x64x64xf32> to vector<64x64xf32>
    %cst_16 = arith.constant dense<0.000000e+00> : vector<64x256xf32>
    %14 = tpu.matmul %13, %3, %cst_16 {dimension_numbers = #tpu.dot_dimension_numbers<[1], [0], [0], [1], [0, 0, 1, 1], [], []>} : vector<64x64xf32>, vector<64x256xf32>, vector<64x256xf32> -> vector<64x256xf32>
    %c0_17 = arith.constant 0 : index
    %c512 = arith.constant 512 : index
    %15 = vector.load %arg7[%c0_17, %c512] : memref<64x1024xf32, #tpu.memory_space<vmem>>, vector<64x256xf32>
    tpu.vector_store %arg7[%c0_17, %c512], %14 {strides = array<i32>} : memref<64x1024xf32, #tpu.memory_space<vmem>>, vector<64x256xf32>,
    %c0_18 = arith.constant 0 : index
    %c3 = arith.constant 3 : index
    %c0_19 = arith.constant 0 : index
    %c0_20 = arith.constant 0 : index
    %16 = vector.load %arg2[%c0_18, %c3, %c0_19, %c0_20] : memref<1x4x64x64xf32, #tpu.memory_space<vmem>>, vector<1x1x64x64xf32>
    %17 = vector.shape_cast %16 : vector<1x1x64x64xf32> to vector<64x64xf32>
    %cst_21 = arith.constant dense<0.000000e+00> : vector<64x256xf32>
    %18 = tpu.matmul %17, %3, %cst_21 {dimension_numbers = #tpu.dot_dimension_numbers<[1], [0], [0], [1], [0, 0, 1, 1], [], []>} : vector<64x64xf32>, vector<64x256xf32>, vector<64x256xf32> -> vector<64x256xf32>
    %c0_22 = arith.constant 0 : index
    %c768 = arith.constant 768 : index
    %19 = vector.load %arg7[%c0_22, %c768] : memref<64x1024xf32, #tpu.memory_space<vmem>>, vector<64x256xf32>
    tpu.vector_store %arg7[%c0_22, %c768], %18 {strides = array<i32>} : memref<64x1024xf32, #tpu.memory_space<vmem>>, vector<64x256xf32>,
    %c0_23 = arith.constant 0 : index
    %c0_24 = arith.constant 0 : index
    %20 = vector.load %arg7[%c0_23, %c0_24] : memref<64x1024xf32, #tpu.memory_space<vmem>>, vector<64x1024xf32>
    %c0_25 = arith.constant 0 : index
    %c0_26 = arith.constant 0 : index
    %c0_27 = arith.constant 0 : index
    %21 = vector.load %arg3[%c0_25, %c0_26, %c0_27] : memref<1x1024x256xf32, #tpu.memory_space<vmem>>, vector<1x1024x256xf32>
    %22 = vector.shape_cast %21 : vector<1x1024x256xf32> to vector<1024x256xf32>
    %cst_28 = arith.constant dense<0.000000e+00> : vector<64x256xf32>
    %23 = tpu.matmul %20, %22, %cst_28 {dimension_numbers = #tpu.dot_dimension_numbers<[1], [0], [0], [1], [0, 0, 1, 1], [], []>} : vector<64x1024xf32>, vector<1024x256xf32>, vector<64x256xf32> -> vector<64x256xf32>
    %c0_29 = arith.constant 0 : index
    %c0_30 = arith.constant 0 : index
    %c0_31 = arith.constant 0 : index
    %24 = vector.load %arg4[%c0_29, %c0_30, %c0_31] : memref<1x1x256xf32, #tpu.memory_space<vmem>>, vector<1x1x256xf32>
    %25 = vector.shape_cast %24 : vector<1x1x256xf32> to vector<1x256xf32>
    %26 = vector.broadcast %25 : vector<1x256xf32> to vector<64x256xf32>
    %27 = arith.addf %23, %26 : vector<64x256xf32>
    %cst_32 = arith.constant 0.000000e+00 : f32
    %28 = vector.broadcast %cst_32 : f32 to vector<64x256xf32>
    %29 = arith.maximumf %27, %28 : vector<64x256xf32>
    %c0_33 = arith.constant 0 : index
    %c0_34 = arith.constant 0 : index
    %30 = vector.load %arg6[%c0_33, %c0_34] : memref<64x256xf32, #tpu.memory_space<vmem>>, vector<64x256xf32>
    tpu.vector_store %arg6[%c0_33, %c0_34], %29 {strides = array<i32>} : memref<64x256xf32, #tpu.memory_space<vmem>>, vector<64x256xf32>,
    %c7_i32 = arith.constant 7 : i32
    %31 = arith.cmpi eq, %arg0, %c7_i32 : i32
    %32 = arith.extui %31 : i1 to i32
    %c0_i32_35 = arith.constant 0 : i32
    %33 = arith.cmpi ne, %32, %c0_i32_35 : i32
    scf.if %33 {
      %34 = math.tanh %27 : vector<64x256xf32>
      %c0_36 = arith.constant 0 : index
      %c0_37 = arith.constant 0 : index
      %35 = vector.load %arg5[%c0_36, %c0_37] : memref<64x256xf32, #tpu.memory_space<vmem>>, vector<64x256xf32>
      tpu.vector_store %arg5[%c0_36, %c0_37], %34 {strides = array<i32>} : memref<64x256xf32, #tpu.memory_space<vmem>>, vector<64x256xf32>,
    } else {
    }
    return
  }
  func.func @transform_0(%arg0: i32) -> (i32, i32) {
    %c0_i32 = arith.constant 0 : i32
    %c0_i32_0 = arith.constant 0 : i32
    %c0_i32_1 = arith.constant 0 : i32
    return %c0_i32, %c0_i32_0 : i32, i32
  }
  func.func @transform_1(%arg0: i32) -> (i32, i32, i32, i32) {
    %c0_i32 = arith.constant 0 : i32
    %c0_i32_0 = arith.constant 0 : i32
    %c0_i32_1 = arith.constant 0 : i32
    %c0_i32_2 = arith.constant 0 : i32
    return %arg0, %c0_i32, %c0_i32_0, %c0_i32_1 : i32, i32, i32, i32
  }
  func.func @transform_2(%arg0: i32) -> (i32, i32, i32) {
    %c0_i32 = arith.constant 0 : i32
    %c0_i32_0 = arith.constant 0 : i32
    %c0_i32_1 = arith.constant 0 : i32
    return %arg0, %c0_i32, %c0_i32_0 : i32, i32, i32
  }
  func.func @transform_3(%arg0: i32) -> (i32, i32, i32) {
    %c0_i32 = arith.constant 0 : i32
    %c0_i32_0 = arith.constant 0 : i32
    %c0_i32_1 = arith.constant 0 : i32
    return %arg0, %c0_i32, %c0_i32_0 : i32, i32, i32
  }
  func.func @transform_4(%arg0: i32) -> (i32, i32) {
    %c0_i32 = arith.constant 0 : i32
    %c0_i32_0 = arith.constant 0 : i32
    %c0_i32_1 = arith.constant 0 : i32
    return %c0_i32, %c0_i32_0 : i32, i32
  }
}

</mosaic_0001>

<bundles_post_ra>
// kernel: forward.1
= control target key start
LH: loop header
LB: loop body
LE: loop exit
PB: predicated region body
PF: predicated region fallthrough
CT: control target
= control target key end

     0   :  { %9 = vsyncpa [#allocation5], 0  ;;  %s3397_s0 = inlined_call_operand.vmem [shape: f32[64,256], index: 0, kind: input, shape index: {}]   ;;  %s3398_s1 = inlined_call_operand.hbm [shape: f32[8,4,64,64], index: 1, kind: input, shape index: {}]   ;;  %s3399_s2 = inlined_call_operand.hbm [shape: f32[8,1024,256], index: 2, kind: input, shape index: {}]   ;;  %s3400_s3 = inlined_call_operand.hbm [shape: f32[8,1,256], index: 3, kind: input, shape index: {}]   ;;  %s3401_s4 = inlined_call_operand.vmem [shape: f32[64,256], index: 4, kind: output, shape index: {}]  }
   0x1   :  { %11 = vsyncpa [#allocation5 + $0x1], 0 }
   0x2   :  { %12 = vsyncpa [#allocation7], 0 }
   0x3   :  { %14 = vsyncpa [#allocation7 + $0x1], 0  ;;  %s2344_s15 = smov 0   ;;  %s2346_s16 = smov 0  }
   0x4   :  { %s2348_s17 = smov 0   ;;  %s2350_s18 = smov 0  }
   0x5 LB: > { %s2363_s19 = sadd.s32 4294967295, %s2313_s18   ;;  %s2366_s20 = sadd.s32 1, %s2313_s18   ;;  %s2313_s18 = sphi %s2350_s18, %s3441_s18   ;;  %s2309_s17 = sphi %s2348_s17, %s3440_s17   ;;  %s2305_s16 = sphi %s2346_s16, %s3439_s16   ;;  %s2301_s15 = sphi %s2344_s15, %s3438_s15  }
   0x6   : > { %s45_s21 = ssub.s32 %s2313_s18, %s2366_s20  ;;  %s48_s22 = sadd.s32 1, %s2309_s17 }
   0x7   : > { %p46_p0 = scmp.eq.s32.totalorder %s45_s21, 0  ;;  %p55_p1 = scmp.ne.s32.totalorder %s2309_s17, %s2305_s16 }
   0x8   : > { %p56_p2 = scmp.eq.s32.totalorder %s2313_s18, 0  ;;  %p61_p3 = scmp.ne.s32.totalorder %s2305_s16, %s2301_s15 }
   0x9   : > { %s2376_s23 = scalar_select %p46_p0, %s2309_s17, %s48_s22  }
   0xa   : > { %p57_p4 = por %p56_p2, %p55_p1  ;;  %p62_p5 = scmp.eq.s32.totalorder %s2363_s19, 0 }
   0xb   : > { %p2116_p6 = scmp.lt.s32.totalorder %s2313_s18, 8  ;;  %s2385_s25 = sand.u32 1, %s2309_s17  }
   0xc   : > { %p2380_p7 = por %p62_p5, %p61_p3  ;;  %s183_s27 = sand.u32 1, %s2313_s18  }
   0xd   : > { %p2387_p8 = pnand %p2116_p6, %p57_p4  ;;  %s1997_s28 = sshll.u32 %s2385_s25, 11 }
   0xe   : > { %s2099_s29 = sshll.u32 %s2313_s18, 11  ;;  %s187_s30 = scalar_lea.vmem [#allocation6], %s1997_s28 }
   0xf   : > { %s195_s5 = sshll.u32 %s187_s30, 4  ;;  %s192_s8 = scalar_lea.hbm %s3399_s2, %s2099_s29  ;;  %s196_s5 = int_to_ptr.vmem [resolvable:$true] %s195_s5 }
  0x10   : > { %s193_s9 = sshll.u32 %s192_s8, 4  ;;  %s2397_s10 = scalar_lea.sflag [#allocation7], %s183_s27  ;;  %s194_s9 = int_to_ptr.hbm [resolvable:$true] %s193_s9 }
  0x11   : > { %s2185_s11 = sshra.s32 %s194_s9, 4  ;;  %p2189_p10 = pneg %p2387_p8  ;;  %s2186_s11 = int_to_ptr.hbm [resolvable:$true] %s2185_s11 }
  0x12   : > { %s2187_s12 = scalar_lea.hbm %s2186_s11, 2048  ;;  %s2192_s15 = scalar_lea.hbm %s3399_s2, 16384 }
  0x13   : > { %p2188_p9 = scmp.ne.s32.totalorder %s2186_s11, %s2187_s12  ;;  %p2193_p13 = scmp.lt.s32.totalorder %s2186_s11, %s3399_s2 }
  0x14   : > { %p2194_p0 = scmp.lt.s32.totalorder %s2192_s15, %s2187_s12 }
  0x15   : > { %p2190_p11 = pnand %p2189_p10, %p2188_p9 }
  0x16   : > { %p2195_p1 = por %p2194_p0, %p2193_p13 }
  0x17   : > { %p2191_p12 = pneg %p2190_p11 }
  0x19   : > { %p2196_p2 = pnand %p2195_p1, %p2191_p12 }
  0x1b   : > { %2199 = shalt.err (!%p2196_p2)
}
  0x1c   : > { %s2315_s27 = smov 256   ;;  %s2316_s28 = smov 16  }
  0x1d   : > { %2112 = dma.hbm_to_vmem [thread:$0]  (!%p2387_p8), %s194_s9, 32768, %s196_s5, %s2397_s10, %s2315_s27, %s2315_s27, %s2316_s28  }
  0x1e   : > { %p2002_p3 = scmp.ge.s32.totalorder %s2313_s18, 1  ;;  %p222_p4 = scmp.lt.s32.totalorder %s2313_s18, 9 }
  0x1f   : > { %s1994_s29 = sshll.u32 %s2385_s25, 8  ;;  %s2098_s6 = sshll.u32 %s2313_s18, 8 }
  0x20   : > { %p2416_p5 = pnand %p2002_p3, %p222_p4  ;;  %s165_s7 = scalar_lea.vmem [#allocation4], %s1994_s29 }
  0x21   : > { %s173_s8 = sshll.u32 %s165_s7, 4  ;;  %s170_s13 = scalar_lea.hbm %s3398_s1, %s2098_s6  ;;  %s174_s8 = int_to_ptr.vmem [resolvable:$true] %s173_s8 }
  0x22   : > { %s171_s14 = sshll.u32 %s170_s13, 4  ;;  %s162_s15 = scalar_lea.sflag [#allocation5], %s2385_s25  ;;  %s172_s14 = int_to_ptr.hbm [resolvable:$true] %s171_s14 }
  0x23   : > { %s2215_s5 = sshra.s32 %s172_s14, 4  ;;  %s2222_s27 = scalar_lea.hbm %s3398_s1, 2048  ;;  %s2216_s5 = int_to_ptr.hbm [resolvable:$true] %s2215_s5 }
  0x24   : > { %s2217_s9 = scalar_lea.hbm %s2216_s5, 256  ;;  %p2223_p12 = scmp.lt.s32.totalorder %s2216_s5, %s3398_s1 }
  0x25   : > { %p2218_p6 = scmp.ne.s32.totalorder %s2216_s5, %s2217_s9  ;;  %p2224_p13 = scmp.lt.s32.totalorder %s2222_s27, %s2217_s9 }
  0x27   : > { %p2220_p9 = pnand %p2218_p6, %p2189_p10  ;;  %p2225_p0 = por %p2224_p13, %p2223_p12 }
  0x29   : > { %p2221_p11 = pneg %p2220_p9 }
  0x2b   : > { %p2226_p1 = pnand %p2225_p0, %p2221_p11 }
  0x2d   : > { %2229 = shalt.err (!%p2226_p1)
}
  0x2e   : > { %s2317_s6 = smov 128   ;;  %s2318_s7 = smov 8  }
  0x2f   : > { %2109 = dma.hbm_to_vmem [thread:$0]  (!%p2387_p8), %s172_s14, 4096, %s174_s8, %s162_s15, %s2317_s6, %s2317_s6, %s2318_s7  }
  0x30   : > { %s2000_s11 = sshll.u32 %s2385_s25, 1  ;;  %s2001_s12 = sshll.u32 %s2313_s18, 1 }
  0x31   : > { %s213_s22 = scalar_lea.hbm %s3400_s3, %s2001_s12  ;;  %s209_s5 = scalar_lea.vmem [#allocation8], %s2000_s11 }
  0x32   : > { %s215_s28 = sshll.u32 %s213_s22, 4  ;;  %s217_s9 = sshll.u32 %s209_s5, 4  ;;  %s216_s28 = int_to_ptr.hbm [resolvable:$true] %s215_s28  ;;  %s218_s9 = int_to_ptr.vmem [resolvable:$true] %s217_s9 }
  0x33   : > { %s2245_s27 = sshra.s32 %s216_s28, 4  ;;  %s2252_s18 = scalar_lea.hbm %s3400_s3, 16  ;;  %s2246_s27 = int_to_ptr.hbm [resolvable:$true] %s2245_s27 }
  0x34   : > { %s2247_s29 = scalar_lea.hbm %s2246_s27, 2  ;;  %p2253_p6 = scmp.lt.s32.totalorder %s2246_s27, %s3400_s3 }
  0x35   : > { %p2248_p2 = scmp.ne.s32.totalorder %s2246_s27, %s2247_s29  ;;  %p2254_p9 = scmp.lt.s32.totalorder %s2252_s18, %s2247_s29 }
  0x37   : > { %p2250_p3 = pnand %p2248_p2, %p2189_p10  ;;  %p2255_p11 = por %p2254_p9, %p2253_p6 }
  0x39   : > { %p2251_p4 = pneg %p2250_p3 }
  0x3b   : > { %p2256_p12 = pnand %p2255_p11, %p2251_p4 }
  0x3d   : > { %2259 = shalt.err (!%p2256_p12)
}
  0x3e   : > { %2115 = dma.hbm_to_vmem [thread:$0]  (!%p2387_p8), %s216_s28, 32, %s218_s9, %s2397_s10  }
  0x3f   : > { %226 = sbr.rel (%p2416_p5) target bundleno = 664 (0x298), region = 36 }
  0x44   : > { %s228_s6 = sand.u32 1, %s2305_s16  }
  0x45   : > { %s2003_s7 = sshll.u32 %s228_s6, 8  ;;  %s229_s11 = scalar_lea.sflag [#allocation5], %s228_s6 }
  0x46   : > { %s2456_s12 = scalar_lea.vmem [#allocation4], %s2003_s7 }
  0x47   : > { %2292 = dma.done.wait (%p2380_p7), %s229_s11, 4096  }
  0x48   : > { %2294 = vsyncadd (%p2380_p7), %s229_s11, 4294963200  ;;  %s238_s26 = sand.u32 1, %s2363_s19   ;;  %s2004_s13 = sshll.u32 %s228_s6, 11 }
  0x49   : > { %s239_s10 = scalar_lea.sflag [#allocation7], %s238_s26  ;;  %s2463_s21 = scalar_lea.vmem [#allocation6], %s2004_s13 }
  0x4a   : > { %2296 = dma.done.wait (%p2380_p7), %s239_s10, 32800  }
  0x4b   : > { %2298 = vsyncadd (%p2380_p7), %s239_s10, 4294934496  ;;  %s2005_s30 = sshll.u32 %s228_s6, 1  ;;  %p2006_p8 = scmp.ne.s32.totalorder %s2363_s19, 0 }
  0x4c   : > { %s2469_s22 = scalar_lea.vmem [#allocation8], %s2005_s30 }
  0x4d   : > { %286 = sbr.rel (%p2006_p8) target bundleno = 99 (0x63), region = 52 }
  0x52   : > { %v287_v0 = vld [vmem:[%s3397_s0] sm:$0xff]  ;;  %v288_v1 = vld [vmem:[%s3397_s0 + $0x8] sm:$0xff]  ;;  %v289_v2 = vld [vmem:[%s3397_s0 + $0x10] sm:$0xff] }
  0x53   : > { %303 = vst [vmem:[#allocation2 + $0x30] sm:$0xff] %v287_v0  ;;  %v290_v3 = vld [vmem:[%s3397_s0 + $0x18] sm:$0xff]  ;;  %v291_v4 = vld [vmem:[%s3397_s0 + $0x20] sm:$0xff]  ;;  %v292_v5 = vld [vmem:[%s3397_s0 + $0x28] sm:$0xff] }
  0x54   : > { %304 = vst [vmem:[#allocation2] sm:$0xff] %v288_v1  ;;  %v293_v6 = vld [vmem:[%s3397_s0 + $0x30] sm:$0xff]  ;;  %v294_v7 = vld [vmem:[%s3397_s0 + $0x38] sm:$0xff]  ;;  %v295_v8 = vld [vmem:[%s3397_s0 + $0x40] sm:$0xff] }
  0x55   : > { %305 = vst [vmem:[#allocation2 + $0x58] sm:$0xff] %v289_v2  ;;  %v296_v9 = vld [vmem:[%s3397_s0 + $0x48] sm:$0xff]  ;;  %v297_v10 = vld [vmem:[%s3397_s0 + $0x50] sm:$0xff]  ;;  %v298_v11 = vld [vmem:[%s3397_s0 + $0x58] sm:$0xff] }
  0x56   : > { %306 = vst [vmem:[#allocation2 + $0x18] sm:$0xff] %v290_v3  ;;  %v299_v12 = vld [vmem:[%s3397_s0 + $0x60] sm:$0xff]  ;;  %v300_v13 = vld [vmem:[%s3397_s0 + $0x68] sm:$0xff]  ;;  %v301_v14 = vld [vmem:[%s3397_s0 + $0x70] sm:$0xff] }
  0x57   : > { %307 = vst [vmem:[#allocation2 + $0x50] sm:$0xff] %v291_v4  ;;  %v302_v15 = vld [vmem:[%s3397_s0 + $0x78] sm:$0xff] }
  0x58   : > { %308 = vst [vmem:[#allocation2 + $0x68] sm:$0xff] %v292_v5 }
  0x59   : > { %309 = vst [vmem:[#allocation2 + $0x8] sm:$0xff] %v293_v6 }
  0x5a   : > { %310 = vst [vmem:[#allocation2 + $0x48] sm:$0xff] %v294_v7 }
  0x5b   : > { %311 = vst [vmem:[#allocation2 + $0x40] sm:$0xff] %v295_v8 }
  0x5c   : > { %312 = vst [vmem:[#allocation2 + $0x20] sm:$0xff] %v296_v9 }
  0x5d   : > { %313 = vst [vmem:[#allocation2 + $0x10] sm:$0xff] %v297_v10 }
  0x5e   : > { %314 = vst [vmem:[#allocation2 + $0x38] sm:$0xff] %v298_v11 }
  0x5f   : > { %315 = vst [vmem:[#allocation2 + $0x60] sm:$0xff] %v299_v12 }
  0x60   : > { %316 = vst [vmem:[#allocation2 + $0x70] sm:$0xff] %v300_v13 }
  0x61   : > { %317 = vst [vmem:[#allocation2 + $0x78] sm:$0xff] %v301_v14 }
  0x62   : > { %318 = vst [vmem:[#allocation2 + $0x28] sm:$0xff] %v302_v15 }
  0x63 PF: > { %v327_v22 = vld [vmem:[#allocation2 + $0x40] sm:$0xff]  ;;  %v325_v24 = vld [vmem:[#allocation2 + $0x8] sm:$0xff]  ;;  %v323_v26 = vld [vmem:[#allocation2 + $0x50] sm:$0xff]  ;;  %vm343_vm0 = vcmask 523264   ;;  %p2095_p7 = scmp.ne.s32.totalorder %s2363_s19, 7 }
  0x64   : > { %v329_v20 = vld [vmem:[#allocation2 + $0x10] sm:$0xff]  ;;  %v328_v23 = vld [vmem:[#allocation2 + $0x20] sm:$0xff]  ;;  %v326_v25 = vld [vmem:[#allocation2 + $0x48] sm:$0xff] }
  0x65   : > { %v330_v21 = vld [vmem:[#allocation2 + $0x38] sm:$0xff]  ;;  %v324_v27 = vld [vmem:[#allocation2 + $0x68] sm:$0xff]  ;;  %v319_v30 = vld [vmem:[#allocation2 + $0x30] sm:$0xff] }
  0x66   : > { %v331_v18 = vld [vmem:[#allocation2 + $0x60] sm:$0xff]  ;;  %v321_v28 = vld [vmem:[#allocation2 + $0x58] sm:$0xff]  ;;  %v336_v34 = vld [vmem:[%s2456_s12 + $0x8] sm:$0xff] }
  0x67   : > { %v332_v19 = vld [vmem:[#allocation2 + $0x70] sm:$0xff]  ;;  %v322_v29 = vld [vmem:[#allocation2 + $0x18] sm:$0xff]  ;;  %v320_v31 = vld [vmem:[#allocation2] sm:$0xff] }
  0x68   : > { %v333_v16 = vld [vmem:[#allocation2 + $0x78] sm:$0xff]  ;;  %v335_v32 = vld [vmem:[%s2456_s12] sm:$0xff]  ;;  %v2024_v35 = vld [vmem:[%s2456_s12 + $0x48] sm:$0xff] }
  0x69   : > { %v334_v17 = vld [vmem:[#allocation2 + $0x28] sm:$0xff]  ;;  %376 = vmatpush.msra.mxu0 %v333_v16  ;;  %507 = vmatpush.msra.mxu2 %v333_v16  ;;  %v2023_v33 = vld [vmem:[%s2456_s12 + $0x40] sm:$0xff]  ;;  %v337_v36 = vld [vmem:[%s2456_s12 + $0x10] sm:$0xff] }
  0x6a   : > { %417 = vmatpush.msra.mxu1 %v334_v17  ;;  %548 = vmatpush.msra.mxu3 %v334_v17  ;;  %v2025_v37 = vld [vmem:[%s2456_s12 + $0x50] sm:$0xff]  ;;  %v338_v38 = vld [vmem:[%s2456_s12 + $0x18] sm:$0xff]  ;;  %v339_v40 = vld [vmem:[%s2456_s12 + $0x20] sm:$0xff] }
  0x6b   : > { %377 = vmatpush.msra.mxu0 %v331_v18  ;;  %508 = vmatpush.msra.mxu2 %v331_v18  ;;  %v2026_v39 = vld [vmem:[%s2456_s12 + $0x58] sm:$0xff]  ;;  %v2027_v41 = vld [vmem:[%s2456_s12 + $0x60] sm:$0xff]  ;;  %v1017_v42 = vld [vmem:[%s2463_s21 + $0x2f0] sm:$0xff] }
  0x6c   : > { %418 = vmatpush.msra.mxu1 %v332_v19  ;;  %549 = vmatpush.msra.mxu3 %v332_v19  ;;  %v953_v43 = vld [vmem:[%s2463_s21 + $0xf0] sm:$0xff]  ;;  %v340_v45 = vld [vmem:[%s2456_s12 + $0x28] sm:$0xff]  ;;  %v1015_v48 = vld [vmem:[%s2463_s21 + $0x2e0] sm:$0xff] }
  0x6d   : > { %378 = vmatpush.msra.mxu0 %v329_v20  ;;  %509 = vmatpush.msra.mxu2 %v329_v20  ;;  %v1049_v44 = vld [vmem:[%s2463_s21 + $0x3f0] sm:$0xff]  ;;  %v2028_v46 = vld [vmem:[%s2456_s12 + $0x68] sm:$0xff]  ;;  %v951_v49 = vld [vmem:[%s2463_s21 + $0xe0] sm:$0xff] }
  0x6e   : > { %419 = vmatpush.msra.mxu1 %v330_v21  ;;  %550 = vmatpush.msra.mxu3 %v330_v21  ;;  %v985_v47 = vld [vmem:[%s2463_s21 + $0x1f0] sm:$0xff]  ;;  %v1047_v50 = vld [vmem:[%s2463_s21 + $0x3e0] sm:$0xff]  ;;  %v342_v1 = vld [vmem:[%s2456_s12 + $0x38] sm:$0xff] }
  0x6f   : > { %379 = vmatpush.msra.mxu0 %v327_v22  ;;  %510 = vmatpush.msra.mxu2 %v327_v22  ;;  %v983_v51 = vld [vmem:[%s2463_s21 + $0x1e0] sm:$0xff]  ;;  %v1013_v52 = vld [vmem:[%s2463_s21 + $0x2d0] sm:$0xff]  ;;  %v2030_v2 = vld [vmem:[%s2456_s12 + $0x78] sm:$0xff] }
  0x70   : > { %420 = vmatpush.msra.mxu1 %v328_v23  ;;  %551 = vmatpush.msra.mxu3 %v328_v23  ;;  %v949_v53 = vld [vmem:[%s2463_s21 + $0xd0] sm:$0xff]  ;;  %v1011_v58 = vld [vmem:[%s2463_s21 + $0x2c0] sm:$0xff] }
  0x71   : > { %380 = vmatpush.msra.mxu0 %v325_v24  ;;  %511 = vmatpush.msra.mxu2 %v325_v24  ;;  %v1045_v54 = vld [vmem:[%s2463_s21 + $0x3d0] sm:$0xff]  ;;  %v947_v59 = vld [vmem:[%s2463_s21 + $0xc0] sm:$0xff] }
  0x72   : > { %421 = vmatpush.msra.mxu1 %v326_v25  ;;  %552 = vmatpush.msra.mxu3 %v326_v25  ;;  %v341_v55 = vld [vmem:[%s2456_s12 + $0x30] sm:$0xff]  ;;  %v1043_v60 = vld [vmem:[%s2463_s21 + $0x3c0] sm:$0xff] }
  0x73   : > { %381 = vmatpush.msra.mxu0 %v323_v26  ;;  %512 = vmatpush.msra.mxu2 %v323_v26  ;;  %v2029_v56 = vld [vmem:[%s2456_s12 + $0x70] sm:$0xff]  ;;  %v979_v61 = vld [vmem:[%s2463_s21 + $0x1c0] sm:$0xff] }
  0x74   : > { %422 = vmatpush.msra.mxu1 %v324_v27  ;;  %553 = vmatpush.msra.mxu3 %v324_v27  ;;  %v981_v57 = vld [vmem:[%s2463_s21 + $0x1d0] sm:$0xff]  ;;  %v1007_v4 = vld [vmem:[%s2463_s21 + $0x2a0] sm:$0xff] }
  0x75   : > { %382 = vmatpush.msra.mxu0 %v321_v28  ;;  %513 = vmatpush.msra.mxu2 %v321_v28  ;;  %v1009_v62 = vld [vmem:[%s2463_s21 + $0x2b0] sm:$0xff]  ;;  %v943_v5 = vld [vmem:[%s2463_s21 + $0xa0] sm:$0xff] }
  0x76   : > { %423 = vmatpush.msra.mxu1 %v322_v29  ;;  %554 = vmatpush.msra.mxu3 %v322_v29  ;;  %v945_v63 = vld [vmem:[%s2463_s21 + $0xb0] sm:$0xff]  ;;  %v1039_v6 = vld [vmem:[%s2463_s21 + $0x3a0] sm:$0xff] }
  0x77   : > { %383 = vmatpush.msra.mxu0 %v319_v30  ;;  %514 = vmatpush.msra.mxu2 %v319_v30  ;;  %v1041_v0 = vld [vmem:[%s2463_s21 + $0x3b0] sm:$0xff]  ;;  %v975_v7 = vld [vmem:[%s2463_s21 + $0x1a0] sm:$0xff] }
  0x78   : > { %424 = vmatpush.msra.mxu1 %v320_v31  ;;  %555 = vmatpush.msra.mxu3 %v320_v31  ;;  %v977_v3 = vld [vmem:[%s2463_s21 + $0x1b0] sm:$0xff]  ;;  %v2047_v11 = vld [vmem:[%s2456_s12 + $0x80] sm:$0xff] }
  0x79   : > { %2007 = vmatmul.msk.f32.vlgmr.msra.gmra.mxu0 %vm343_vm0, %v335_v32  ;;  %2015 = vmatmul.msk.f32.vlgmr.msra.gmra.mxu1 %vm343_vm0, %v335_v32  ;;  %v1005_v8 = vld [vmem:[%s2463_s21 + $0x290] sm:$0xff]  ;;  %v2071_v12 = vld [vmem:[%s2456_s12 + $0xc0] sm:$0xff] }
  0x7a   : > { %2031 = vmatmul.msk.f32.vlgmr.msra.gmra.mxu2 %vm343_vm0, %v2023_v33  ;;  %2039 = vmatmul.msk.f32.vlgmr.msra.gmra.mxu3 %vm343_vm0, %v2023_v33  ;;  %v941_v9 = vld [vmem:[%s2463_s21 + $0x90] sm:$0xff]  ;;  %v1003_v14 = vld [vmem:[%s2463_s21 + $0x280] sm:$0xff] }
  0x7b   : > { %769 = vmatpush.msrb.mxu2 %v333_v16  ;;  %810 = vmatpush.msrb.mxu3 %v334_v17  ;;  %v1037_v10 = vld [vmem:[%s2463_s21 + $0x390] sm:$0xff]  ;;  %v939_v15 = vld [vmem:[%s2463_s21 + $0x80] sm:$0xff] }
  0x7c   : > { %638 = vmatpush.msrb.mxu0 %v333_v16  ;;  %679 = vmatpush.msrb.mxu1 %v334_v17  ;;  %v973_v13 = vld [vmem:[%s2463_s21 + $0x190] sm:$0xff]  ;;  %v1035_v16 = vld [vmem:[%s2463_s21 + $0x380] sm:$0xff] }
  0x7d   : > { %770 = vmatpush.msrb.mxu2 %v331_v18  ;;  %811 = vmatpush.msrb.mxu3 %v332_v19  ;;  %v971_v17 = vld [vmem:[%s2463_s21 + $0x180] sm:$0xff]  ;;  %v2073_v32 = vld [vmem:[%s2456_s12 + $0xd0] sm:$0xff] }
  0x7e   : > { %639 = vmatpush.msrb.mxu0 %v331_v18  ;;  %680 = vmatpush.msrb.mxu1 %v332_v19  ;;  %v1001_v18 = vld [vmem:[%s2463_s21 + $0x270] sm:$0xff] }
  0x7f   : > { %771 = vmatpush.msrb.mxu2 %v329_v20  ;;  %812 = vmatpush.msrb.mxu3 %v330_v21  ;;  %v937_v19 = vld [vmem:[%s2463_s21 + $0x70] sm:$0xff] }
  0x80   : > { %640 = vmatpush.msrb.mxu0 %v329_v20  ;;  %681 = vmatpush.msrb.mxu1 %v330_v21  ;;  %v1033_v20 = vld [vmem:[%s2463_s21 + $0x370] sm:$0xff]  ;;  %v2048_v21 = vld [vmem:[%s2456_s12 + $0x88] sm:$0xff] }
  0x81   : > { %2008 = vmatmul.msk.f32.gmra.mxu0 %vm343_vm0, %v336_v34  ;;  %2016 = vmatmul.msk.f32.gmra.mxu1 %vm343_vm0, %v336_v34  ;;  %v965_v33 = vld [vmem:[%s2463_s21 + $0x150] sm:$0xff]  ;;  %v995_v34 = vld [vmem:[%s2463_s21 + $0x240] sm:$0xff] }
  0x82   : > { %2032 = vmatmul.msk.f32.gmra.mxu2 %vm343_vm0, %v2024_v35  ;;  %2040 = vmatmul.msk.f32.gmra.mxu3 %vm343_vm0, %v2024_v35  ;;  %v931_v35 = vld [vmem:[%s2463_s21 + $0x40] sm:$0xff] }
  0x83   : > { %772 = vmatpush.msrb.mxu2 %v327_v22  ;;  %813 = vmatpush.msrb.mxu3 %v328_v23 }
  0x84   : > { %641 = vmatpush.msrb.mxu0 %v327_v22  ;;  %682 = vmatpush.msrb.mxu1 %v328_v23  ;;  %v2072_v22 = vld [vmem:[%s2456_s12 + $0xc8] sm:$0xff]  ;;  %v969_v23 = vld [vmem:[%s2463_s21 + $0x170] sm:$0xff] }
  0x85   : > { %773 = vmatpush.msrb.mxu2 %v325_v24  ;;  %814 = vmatpush.msrb.mxu3 %v326_v25 }
  0x86   : > { %642 = vmatpush.msrb.mxu0 %v325_v24  ;;  %683 = vmatpush.msrb.mxu1 %v326_v25  ;;  %v999_v24 = vld [vmem:[%s2463_s21 + $0x260] sm:$0xff] }
  0x87   : > { %774 = vmatpush.msrb.mxu2 %v323_v26  ;;  %815 = vmatpush.msrb.mxu3 %v324_v27  ;;  %v935_v25 = vld [vmem:[%s2463_s21 + $0x60] sm:$0xff] }
  0x88   : > { %643 = vmatpush.msrb.mxu0 %v323_v26  ;;  %684 = vmatpush.msrb.mxu1 %v324_v27  ;;  %v1031_v26 = vld [vmem:[%s2463_s21 + $0x360] sm:$0xff] }
  0x89   : > { %2009 = vmatmul.msk.f32.gmra.mxu0 %vm343_vm0, %v337_v36  ;;  %2017 = vmatmul.msk.f32.gmra.mxu1 %vm343_vm0, %v337_v36  ;;  %v967_v27 = vld [vmem:[%s2463_s21 + $0x160] sm:$0xff] }
  0x8a   : > { %2033 = vmatmul.msk.f32.gmra.mxu2 %vm343_vm0, %v2025_v37  ;;  %2041 = vmatmul.msk.f32.gmra.mxu3 %vm343_vm0, %v2025_v37  ;;  %v1027_v36 = vld [vmem:[%s2463_s21 + $0x340] sm:$0xff] }
  0x8b   : > { %775 = vmatpush.msrb.mxu2 %v321_v28  ;;  %816 = vmatpush.msrb.mxu3 %v322_v29  ;;  %v963_v37 = vld [vmem:[%s2463_s21 + $0x140] sm:$0xff] }
  0x8c   : > { %644 = vmatpush.msrb.mxu0 %v321_v28  ;;  %685 = vmatpush.msrb.mxu1 %v322_v29  ;;  %v997_v28 = vld [vmem:[%s2463_s21 + $0x250] sm:$0xff] }
  0x8d   : > { %776 = vmatpush.msrb.mxu2 %v319_v30  ;;  %817 = vmatpush.msrb.mxu3 %v320_v31  ;;  %v933_v29 = vld [vmem:[%s2463_s21 + $0x50] sm:$0xff] }
  0x8e   : > { %645 = vmatpush.msrb.mxu0 %v319_v30  ;;  %686 = vmatpush.msrb.mxu1 %v320_v31  ;;  %v1029_v30 = vld [vmem:[%s2463_s21 + $0x350] sm:$0xff] }
  0x8f   : > { %1267 = vmatpush.msra.mxu2 %v1017_v42  ;;  %1308 = vmatpush.msra.mxu3 %v1049_v44  ;;  %v2049_v31 = vld [vmem:[%s2456_s12 + $0x90] sm:$0xff]  ;;  %v2074_v42 = vld [vmem:[%s2456_s12 + $0xd8] sm:$0xff]  ;;  %v991_v44 = vld [vmem:[%s2463_s21 + $0x220] sm:$0xff] }
  0x90   : > { %1185 = vmatpush.msra.mxu0 %v953_v43  ;;  %1226 = vmatpush.msra.mxu1 %v985_v47  ;;  %v961_v43 = vld [vmem:[%s2463_s21 + $0x130] sm:$0xff]  ;;  %v959_v47 = vld [vmem:[%s2463_s21 + $0x120] sm:$0xff] }
  0x91   : > { %2010 = vmatmul.msk.f32.gmra.mxu0 %vm343_vm0, %v338_v38  ;;  %2018 = vmatmul.msk.f32.gmra.mxu1 %vm343_vm0, %v338_v38  ;;  %v993_v38 = vld [vmem:[%s2463_s21 + $0x230] sm:$0xff] }
  0x92   : > { %2034 = vmatmul.msk.f32.gmra.mxu2 %vm343_vm0, %v2026_v39  ;;  %2042 = vmatmul.msk.f32.gmra.mxu3 %vm343_vm0, %v2026_v39  ;;  %v929_v39 = vld [vmem:[%s2463_s21 + $0x30] sm:$0xff] }
  0x93   : > { %1268 = vmatpush.msra.mxu2 %v1015_v48  ;;  %1186 = vmatpush.msra.mxu0 %v951_v49  ;;  %v989_v48 = vld [vmem:[%s2463_s21 + $0x210] sm:$0xff]  ;;  %v2051_v49 = vld [vmem:[%s2456_s12 + $0xa0] sm:$0xff] }
  0x94   : > { %1309 = vmatpush.msra.mxu3 %v1047_v50  ;;  %1227 = vmatpush.msra.mxu1 %v983_v51  ;;  %v925_v50 = vld [vmem:[%s2463_s21 + $0x10] sm:$0xff] }
  0x95   : > { %1269 = vmatpush.msra.mxu2 %v1013_v52  ;;  %1187 = vmatpush.msra.mxu0 %v949_v53  ;;  %v957_v51 = vld [vmem:[%s2463_s21 + $0x110] sm:$0xff]  ;;  %v2075_v53 = vld [vmem:[%s2456_s12 + $0xe0] sm:$0xff] }
  0x96   : > { %1310 = vmatpush.msra.mxu3 %v1045_v54  ;;  %1228 = vmatpush.msra.mxu1 %v981_v57  ;;  %v1021_v52 = vld [vmem:[%s2463_s21 + $0x310] sm:$0xff]  ;;  %v923_v54 = vld [vmem:[%s2463_s21] sm:$0xff] }
  0x97   : > { %1270 = vmatpush.msra.mxu2 %v1011_v58  ;;  %1188 = vmatpush.msra.mxu0 %v947_v59  ;;  %v1019_v57 = vld [vmem:[%s2463_s21 + $0x300] sm:$0xff]  ;;  %v2052_v58 = vld [vmem:[%s2456_s12 + $0xa8] sm:$0xff]  ;;  %v1145_v59 = vld [vmem:[%s2463_s21 + $0x6f0] sm:$0xff] }
  0x98   : > { %1311 = vmatpush.msra.mxu3 %v1043_v60  ;;  %1229 = vmatpush.msra.mxu1 %v979_v61  ;;  %v1081_v60 = vld [vmem:[%s2463_s21 + $0x4f0] sm:$0xff] }
  0x99   : > { %2011 = vmatmul.msk.f32.gmra.mxu0 %vm343_vm0, %v339_v40  ;;  %2019 = vmatmul.msk.f32.gmra.mxu1 %vm343_vm0, %v339_v40  ;;  %v1025_v40 = vld [vmem:[%s2463_s21 + $0x330] sm:$0xff] }
  0x9a   : > { %2035 = vmatmul.msk.f32.gmra.mxu2 %vm343_vm0, %v2027_v41  ;;  %2043 = vmatmul.msk.f32.gmra.mxu3 %vm343_vm0, %v2027_v41  ;;  %v2050_v41 = vld [vmem:[%s2456_s12 + $0x98] sm:$0xff]  ;;  %v1177_v61 = vld [vmem:[%s2463_s21 + $0x7f0] sm:$0xff] }
  0x9b   : > { %1271 = vmatpush.msra.mxu2 %v1009_v62  ;;  %1189 = vmatpush.msra.mxu0 %v945_v63  ;;  %v2076_v62 = vld [vmem:[%s2456_s12 + $0xe8] sm:$0xff]  ;;  %v1113_v63 = vld [vmem:[%s2463_s21 + $0x5f0] sm:$0xff] }
  0x9c   : > { %1312 = vmatpush.msra.mxu3 %v1041_v0  ;;  %1230 = vmatpush.msra.mxu1 %v977_v3  ;;  %v1143_v0 = vld [vmem:[%s2463_s21 + $0x6e0] sm:$0xff]  ;;  %v2053_v3 = vld [vmem:[%s2456_s12 + $0xb0] sm:$0xff] }
  0x9d   : > { %1272 = vmatpush.msra.mxu2 %v1007_v4  ;;  %1190 = vmatpush.msra.mxu0 %v943_v5  ;;  %v1111_v4 = vld [vmem:[%s2463_s21 + $0x5e0] sm:$0xff]  ;;  %v1141_v5 = vld [vmem:[%s2463_s21 + $0x6d0] sm:$0xff] }
  0x9e   : > { %1313 = vmatpush.msra.mxu3 %v1039_v6  ;;  %1231 = vmatpush.msra.mxu1 %v975_v7  ;;  %v1077_v6 = vld [vmem:[%s2463_s21 + $0x4d0] sm:$0xff] }
  0x9f   : > { %1273 = vmatpush.msra.mxu2 %v1005_v8  ;;  %1191 = vmatpush.msra.mxu0 %v941_v9  ;;  %v2077_v7 = vld [vmem:[%s2456_s12 + $0xf0] sm:$0xff] }
  0xa0   : > { %1314 = vmatpush.msra.mxu3 %v1037_v10  ;;  %1232 = vmatpush.msra.mxu1 %v973_v13  ;;  %v1173_v8 = vld [vmem:[%s2463_s21 + $0x7d0] sm:$0xff]  ;;  %v1139_v10 = vld [vmem:[%s2463_s21 + $0x6c0] sm:$0xff]  ;;  %v2054_v13 = vld [vmem:[%s2456_s12 + $0xb8] sm:$0xff] }
  0xa1   : > { %2012 = vmatmul.msk.f32.gmra.mxu0 %vm343_vm0, %v340_v45  ;;  %2020 = vmatmul.msk.f32.gmra.mxu1 %vm343_vm0, %v340_v45  ;;  %v927_v45 = vld [vmem:[%s2463_s21 + $0x20] sm:$0xff]  ;;  %v1109_v9 = vld [vmem:[%s2463_s21 + $0x5d0] sm:$0xff] }
  0xa2   : > { %2036 = vmatmul.msk.f32.gmra.mxu2 %vm343_vm0, %v2028_v46  ;;  %2044 = vmatmul.msk.f32.gmra.mxu3 %vm343_vm0, %v2028_v46  ;;  %v1023_v46 = vld [vmem:[%s2463_s21 + $0x320] sm:$0xff] }
  0xa3   : > { %1274 = vmatpush.msra.mxu2 %v1003_v14  ;;  %1192 = vmatpush.msra.mxu0 %v939_v15  ;;  %v1107_v14 = vld [vmem:[%s2463_s21 + $0x5c0] sm:$0xff]  ;;  %v1137_v15 = vld [vmem:[%s2463_s21 + $0x6b0] sm:$0xff] }
  0xa4   : > { %1315 = vmatpush.msra.mxu3 %v1035_v16  ;;  %1233 = vmatpush.msra.mxu1 %v971_v17  ;;  %v1073_v16 = vld [vmem:[%s2463_s21 + $0x4b0] sm:$0xff]  ;;  %v2078_v17 = vld [vmem:[%s2456_s12 + $0xf8] sm:$0xff] }
  0xa5   : > { %1275 = vmatpush.msra.mxu2 %v1001_v18  ;;  %1193 = vmatpush.msra.mxu0 %v937_v19  ;;  %v1169_v18 = vld [vmem:[%s2463_s21 + $0x7b0] sm:$0xff] }
  0xa6   : > { %1316 = vmatpush.msra.mxu3 %v1033_v20  ;;  %1234 = vmatpush.msra.mxu1 %v969_v23  ;;  %v1105_v19 = vld [vmem:[%s2463_s21 + $0x5b0] sm:$0xff]  ;;  %v1135_v20 = vld [vmem:[%s2463_s21 + $0x6a0] sm:$0xff] }
  0xa7   : > { %1276 = vmatpush.msra.mxu2 %v999_v24  ;;  %1194 = vmatpush.msra.mxu0 %v935_v25  ;;  %v1103_v25 = vld [vmem:[%s2463_s21 + $0x5a0] sm:$0xff] }
  0xa8   : > { %1317 = vmatpush.msra.mxu3 %v1031_v26  ;;  %1235 = vmatpush.msra.mxu1 %v967_v27  ;;  %v1133_v26 = vld [vmem:[%s2463_s21 + $0x690] sm:$0xff] }
  0xa9   : > { %2013 = vmatmul.msk.f32.gmra.mxu0 %vm343_vm0, %v341_v55  ;;  %2021 = vmatmul.msk.f32.gmra.mxu1 %vm343_vm0, %v341_v55  ;;  %v955_v55 = vld [vmem:[%s2463_s21 + $0x100] sm:$0xff]  ;;  %v1069_v27 = vld [vmem:[%s2463_s21 + $0x490] sm:$0xff] }
  0xaa   : > { %2037 = vmatmul.msk.f32.gmra.mxu2 %vm343_vm0, %v2029_v56  ;;  %2045 = vmatmul.msk.f32.gmra.mxu3 %vm343_vm0, %v2029_v56  ;;  %v987_v56 = vld [vmem:[%s2463_s21 + $0x200] sm:$0xff] }
  0xab   : > { %1277 = vmatpush.msra.mxu2 %v997_v28  ;;  %1195 = vmatpush.msra.mxu0 %v933_v29  ;;  %v1165_v28 = vld [vmem:[%s2463_s21 + $0x790] sm:$0xff] }
  0xac   : > { %1318 = vmatpush.msra.mxu3 %v1029_v30  ;;  %1236 = vmatpush.msra.mxu1 %v965_v33  ;;  %v1101_v29 = vld [vmem:[%s2463_s21 + $0x590] sm:$0xff]  ;;  %v1131_v30 = vld [vmem:[%s2463_s21 + $0x680] sm:$0xff] }
  0xad   : > { %1278 = vmatpush.msra.mxu2 %v995_v34  ;;  %1196 = vmatpush.msra.mxu0 %v931_v35 }
  0xae   : > { %1319 = vmatpush.msra.mxu3 %v1027_v36  ;;  %1237 = vmatpush.msra.mxu1 %v963_v37  ;;  %v1099_v37 = vld [vmem:[%s2463_s21 + $0x580] sm:$0xff] }
  0xaf   : > { %1279 = vmatpush.msra.mxu2 %v993_v38  ;;  %1197 = vmatpush.msra.mxu0 %v929_v39  ;;  %v1129_v38 = vld [vmem:[%s2463_s21 + $0x670] sm:$0xff] }
  0xb0   : > { %1320 = vmatpush.msra.mxu3 %v1025_v40  ;;  %1238 = vmatpush.msra.mxu1 %v961_v43  ;;  %v1065_v39 = vld [vmem:[%s2463_s21 + $0x470] sm:$0xff]  ;;  %v1063_v43 = vld [vmem:[%s2463_s21 + $0x460] sm:$0xff] }
  0xb1   : > { %2014 = vmatmul.msk.f32.gmra.mxu0 %vm343_vm0, %v342_v1  ;;  %2022 = vmatmul.msk.f32.gmra.mxu1 %vm343_vm0, %v342_v1  ;;  %v1079_v1 = vld [vmem:[%s2463_s21 + $0x4e0] sm:$0xff]  ;;  %v1161_v40 = vld [vmem:[%s2463_s21 + $0x770] sm:$0xff] }
  0xb2   : > { %2038 = vmatmul.msk.f32.gmra.mxu2 %vm343_vm0, %v2030_v2  ;;  %2046 = vmatmul.msk.f32.gmra.mxu3 %vm343_vm0, %v2030_v2  ;;  %v1175_v2 = vld [vmem:[%s2463_s21 + $0x7e0] sm:$0xff] }
  0xb3   : > { %1280 = vmatpush.msra.mxu2 %v991_v44  ;;  %1198 = vmatpush.msra.mxu0 %v927_v45  ;;  %v1159_v44 = vld [vmem:[%s2463_s21 + $0x760] sm:$0xff] }
  0xb4   : > { %1321 = vmatpush.msra.mxu3 %v1023_v46  ;;  %1239 = vmatpush.msra.mxu1 %v959_v47 }
  0xb5   : > { %1281 = vmatpush.msra.mxu2 %v989_v48  ;;  %1199 = vmatpush.msra.mxu0 %v925_v50  ;;  %v1125_v50 = vld [vmem:[%s2463_s21 + $0x650] sm:$0xff] }
  0xb6   : > { %1240 = vmatpush.msra.mxu1 %v957_v51  ;;  %1322 = vmatpush.msra.mxu3 %v1021_v52  ;;  %v1061_v51 = vld [vmem:[%s2463_s21 + $0x450] sm:$0xff] }
  0xb7   : > { %1200 = vmatpush.msra.mxu0 %v923_v54  ;;  %1282 = vmatpush.msra.mxu2 %v987_v56  ;;  %v1157_v52 = vld [vmem:[%s2463_s21 + $0x750] sm:$0xff]  ;;  %v1123_v54 = vld [vmem:[%s2463_s21 + $0x640] sm:$0xff] }
  0xb8   : > { %1241 = vmatpush.msra.mxu1 %v955_v55  ;;  %1323 = vmatpush.msra.mxu3 %v1019_v57  ;;  %v1059_v55 = vld [vmem:[%s2463_s21 + $0x440] sm:$0xff] }
  0xb9   : > { %2055 = vmatmul.msk.f32.vlgmr.msrb.gmra.mxu0 %vm343_vm0, %v2047_v11  ;;  %2063 = vmatmul.msk.f32.vlgmr.msrb.gmra.mxu1 %vm343_vm0, %v2047_v11  ;;  %v1075_v11 = vld [vmem:[%s2463_s21 + $0x4c0] sm:$0xff] }
  0xba   : > { %2079 = vmatmul.msk.f32.vlgmr.msrb.gmra.mxu2 %vm343_vm0, %v2071_v12  ;;  %2087 = vmatmul.msk.f32.vlgmr.msrb.gmra.mxu3 %vm343_vm0, %v2071_v12  ;;  %v1171_v12 = vld [vmem:[%s2463_s21 + $0x7c0] sm:$0xff] }
  0xbb   : > { %1431 = vmatpush.msrb.mxu2 %v1145_v59  ;;  %1349 = vmatpush.msrb.mxu0 %v1081_v60  ;;  %v1155_v56 = vld [vmem:[%s2463_s21 + $0x740] sm:$0xff] }
  0xbc   : > { %1472 = vmatpush.msrb.mxu3 %v1177_v61  ;;  %1390 = vmatpush.msrb.mxu1 %v1113_v63  ;;  %v1091_v61 = vld [vmem:[%s2463_s21 + $0x540] sm:$0xff]  ;;  %v1057_v63 = vld [vmem:[%s2463_s21 + $0x430] sm:$0xff] }
  0xbd   : > { %1432 = vmatpush.msrb.mxu2 %v1143_v0  ;;  %1350 = vmatpush.msrb.mxu0 %v1079_v1  ;;  %v1153_v0 = vld [vmem:[%s2463_s21 + $0x730] sm:$0xff] }
  0xbe   : > { %1473 = vmatpush.msrb.mxu3 %v1175_v2  ;;  %1391 = vmatpush.msrb.mxu1 %v1111_v4  ;;  %v1089_v1 = vld [vmem:[%s2463_s21 + $0x530] sm:$0xff]  ;;  %v1119_v2 = vld [vmem:[%s2463_s21 + $0x620] sm:$0xff] }
  0xbf   : > { %1433 = vmatpush.msrb.mxu2 %v1141_v5  ;;  %1351 = vmatpush.msrb.mxu0 %v1077_v6  ;;  %v1151_v4 = vld [vmem:[%s2463_s21 + $0x720] sm:$0xff] }
  0xc0   : > { %1474 = vmatpush.msrb.mxu3 %v1173_v8  ;;  %1392 = vmatpush.msrb.mxu1 %v1109_v9  ;;  %v1087_v5 = vld [vmem:[%s2463_s21 + $0x520] sm:$0xff] }
  0xc1   : > { %2056 = vmatmul.msk.f32.gmra.mxu0 %vm343_vm0, %v2048_v21  ;;  %2064 = vmatmul.msk.f32.gmra.mxu1 %vm343_vm0, %v2048_v21  ;;  %v1071_v21 = vld [vmem:[%s2463_s21 + $0x4a0] sm:$0xff] }
  0xc2   : > { %2080 = vmatmul.msk.f32.gmra.mxu2 %vm343_vm0, %v2072_v22  ;;  %2088 = vmatmul.msk.f32.gmra.mxu3 %vm343_vm0, %v2072_v22  ;;  %v1167_v22 = vld [vmem:[%s2463_s21 + $0x7a0] sm:$0xff] }
  0xc3   : > { %1434 = vmatpush.msrb.mxu2 %v1139_v10  ;;  %1352 = vmatpush.msrb.mxu0 %v1075_v11  ;;  %v1117_v10 = vld [vmem:[%s2463_s21 + $0x610] sm:$0xff] }
  0xc4   : > { %1475 = vmatpush.msrb.mxu3 %v1171_v12  ;;  %1393 = vmatpush.msrb.mxu1 %v1107_v14  ;;  %v1053_v11 = vld [vmem:[%s2463_s21 + $0x410] sm:$0xff]  ;;  %v1051_v14 = vld [vmem:[%s2463_s21 + $0x400] sm:$0xff] }
  0xc5   : > { %1435 = vmatpush.msrb.mxu2 %v1137_v15  ;;  %1353 = vmatpush.msrb.mxu0 %v1073_v16  ;;  %v1085_v12 = vld [vmem:[%s2463_s21 + $0x510] sm:$0xff]  ;;  %v1083_v15 = vld [vmem:[%s2463_s21 + $0x500] sm:$0xff] }
  0xc6   : > { %1476 = vmatpush.msrb.mxu3 %v1169_v18  ;;  %1394 = vmatpush.msrb.mxu1 %v1105_v19  ;;  %v1115_v16 = vld [vmem:[%s2463_s21 + $0x600] sm:$0xff] }
  0xc7   : > { %1436 = vmatpush.msrb.mxu2 %v1135_v20  ;;  %1354 = vmatpush.msrb.mxu0 %v1071_v21 }
  0xc8   : > { %1477 = vmatpush.msrb.mxu3 %v1167_v22  ;;  %1395 = vmatpush.msrb.mxu1 %v1103_v25  ;;  %v1018_v22 = vld [vmem:[%s2463_s21 + $0x2f8] sm:$0xff] }
  0xc9   : > { %2057 = vmatmul.msk.f32.gmra.mxu0 %vm343_vm0, %v2049_v31  ;;  %2065 = vmatmul.msk.f32.gmra.mxu1 %vm343_vm0, %v2049_v31  ;;  %v1067_v31 = vld [vmem:[%s2463_s21 + $0x480] sm:$0xff]  ;;  %v954_v25 = vld [vmem:[%s2463_s21 + $0xf8] sm:$0xff] }
  0xca   : > { %2081 = vmatmul.msk.f32.gmra.mxu2 %vm343_vm0, %v2073_v32  ;;  %2089 = vmatmul.msk.f32.gmra.mxu3 %vm343_vm0, %v2073_v32  ;;  %v1163_v32 = vld [vmem:[%s2463_s21 + $0x780] sm:$0xff] }
  0xcb   : > { %1437 = vmatpush.msrb.mxu2 %v1133_v26  ;;  %1355 = vmatpush.msrb.mxu0 %v1069_v27  ;;  %v1050_v26 = vld [vmem:[%s2463_s21 + $0x3f8] sm:$0xff] }
  0xcc   : > { %1478 = vmatpush.msrb.mxu3 %v1165_v28  ;;  %1396 = vmatpush.msrb.mxu1 %v1101_v29  ;;  %v986_v27 = vld [vmem:[%s2463_s21 + $0x1f8] sm:$0xff]  ;;  %v1016_v28 = vld [vmem:[%s2463_s21 + $0x2e8] sm:$0xff] }
  0xcd   : > { %1438 = vmatpush.msrb.mxu2 %v1131_v30  ;;  %1356 = vmatpush.msrb.mxu0 %v1067_v31  ;;  %v952_v29 = vld [vmem:[%s2463_s21 + $0xe8] sm:$0xff] }
  0xce   : > { %1479 = vmatpush.msrb.mxu3 %v1163_v32  ;;  %1397 = vmatpush.msrb.mxu1 %v1099_v37  ;;  %v1048_v30 = vld [vmem:[%s2463_s21 + $0x3e8] sm:$0xff] }
  0xcf   : > { %1439 = vmatpush.msrb.mxu2 %v1129_v38  ;;  %1357 = vmatpush.msrb.mxu0 %v1065_v39  ;;  %v984_v39 = vld [vmem:[%s2463_s21 + $0x1e8] sm:$0xff] }
  0xd0   : > { %1480 = vmatpush.msrb.mxu3 %v1161_v40  ;;  %v1014_v40 = vld [vmem:[%s2463_s21 + $0x2d8] sm:$0xff] }
  0xd1   : > { %2058 = vmatmul.msk.f32.gmra.mxu0 %vm343_vm0, %v2050_v41  ;;  %2066 = vmatmul.msk.f32.gmra.mxu1 %vm343_vm0, %v2050_v41  ;;  %v1097_v41 = vld [vmem:[%s2463_s21 + $0x570] sm:$0xff] }
  0xd2   : > { %2082 = vmatmul.msk.f32.gmra.mxu2 %vm343_vm0, %v2074_v42  ;;  %2090 = vmatmul.msk.f32.gmra.mxu3 %vm343_vm0, %v2074_v42  ;;  %v1127_v42 = vld [vmem:[%s2463_s21 + $0x660] sm:$0xff] }
  0xd3   : > { %1398 = vmatpush.msrb.mxu1 %v1097_v41  ;;  %1440 = vmatpush.msrb.mxu2 %v1127_v42  ;;  %v950_v41 = vld [vmem:[%s2463_s21 + $0xd8] sm:$0xff] }
  0xd4   : > { %1358 = vmatpush.msrb.mxu0 %v1063_v43  ;;  %1481 = vmatpush.msrb.mxu3 %v1159_v44  ;;  %v1046_v42 = vld [vmem:[%s2463_s21 + $0x3d8] sm:$0xff]  ;;  %v1012_v44 = vld [vmem:[%s2463_s21 + $0x2c8] sm:$0xff] }
  0xd5   : > { %1441 = vmatpush.msrb.mxu2 %v1125_v50  ;;  %v982_v43 = vld [vmem:[%s2463_s21 + $0x1d8] sm:$0xff]  ;;  %v1044_v50 = vld [vmem:[%s2463_s21 + $0x3c8] sm:$0xff] }
  0xd6   : > { %1359 = vmatpush.msrb.mxu0 %v1061_v51  ;;  %1482 = vmatpush.msrb.mxu3 %v1157_v52 }
  0xd7   : > { %1442 = vmatpush.msrb.mxu2 %v1123_v54 }
  0xd8   : > { %1360 = vmatpush.msrb.mxu0 %v1059_v55  ;;  %1483 = vmatpush.msrb.mxu3 %v1155_v56  ;;  %v980_v55 = vld [vmem:[%s2463_s21 + $0x1c8] sm:$0xff]  ;;  %v1010_v56 = vld [vmem:[%s2463_s21 + $0x2b8] sm:$0xff] }
  0xd9   : > { %2059 = vmatmul.msk.f32.gmra.mxu0 %vm343_vm0, %v2051_v49  ;;  %2067 = vmatmul.msk.f32.gmra.mxu1 %vm343_vm0, %v2051_v49  ;;  %v1095_v49 = vld [vmem:[%s2463_s21 + $0x560] sm:$0xff] }
  0xda   : > { %2083 = vmatmul.msk.f32.gmra.mxu2 %vm343_vm0, %v2075_v53  ;;  %2091 = vmatmul.msk.f32.gmra.mxu3 %vm343_vm0, %v2075_v53  ;;  %v1093_v53 = vld [vmem:[%s2463_s21 + $0x550] sm:$0xff] }
  0xdb   : > { %1399 = vmatpush.msrb.mxu1 %v1095_v49  ;;  %1361 = vmatpush.msrb.mxu0 %v1057_v63  ;;  %v948_v49 = vld [vmem:[%s2463_s21 + $0xc8] sm:$0xff]  ;;  %v978_v63 = vld [vmem:[%s2463_s21 + $0x1b8] sm:$0xff] }
  0xdc   : > { %1484 = vmatpush.msrb.mxu3 %v1153_v0  ;;  %v1008_v0 = vld [vmem:[%s2463_s21 + $0x2a8] sm:$0xff] }
  0xdd   : > { %1400 = vmatpush.msrb.mxu1 %v1093_v53 }
  0xde   : > { %1485 = vmatpush.msrb.mxu3 %v1151_v4 }
  0xdf   : > { %1401 = vmatpush.msrb.mxu1 %v1091_v61  ;;  %v946_v61 = vld [vmem:[%s2463_s21 + $0xb8] sm:$0xff] }
  0xe1   : > { %2060 = vmatmul.msk.f32.gmra.mxu0 %vm343_vm0, %v2052_v58  ;;  %2068 = vmatmul.msk.f32.gmra.mxu1 %vm343_vm0, %v2052_v58 }
  0xe2   : > { %2084 = vmatmul.msk.f32.gmra.mxu2 %vm343_vm0, %v2076_v62  ;;  %2092 = vmatmul.msk.f32.gmra.mxu3 %vm343_vm0, %v2076_v62  ;;  %v1121_v62 = vld [vmem:[%s2463_s21 + $0x630] sm:$0xff] }
  0xe3   : > { %1443 = vmatpush.msrb.mxu2 %v1121_v62  ;;  %1402 = vmatpush.msrb.mxu1 %v1089_v1  ;;  %v1042_v62 = vld [vmem:[%s2463_s21 + $0x3b8] sm:$0xff]  ;;  %v944_v1 = vld [vmem:[%s2463_s21 + $0xa8] sm:$0xff] }
  0xe5   : > { %1444 = vmatpush.msrb.mxu2 %v1119_v2  ;;  %1403 = vmatpush.msrb.mxu1 %v1087_v5  ;;  %v1040_v2 = vld [vmem:[%s2463_s21 + $0x3a8] sm:$0xff] }
  0xe7   : > { %1445 = vmatpush.msrb.mxu2 %v1117_v10  ;;  %1404 = vmatpush.msrb.mxu1 %v1085_v12  ;;  %v1006_v12 = vld [vmem:[%s2463_s21 + $0x298] sm:$0xff] }
  0xe9   : > { %2061 = vmatmul.msk.f32.gmra.mxu0 %vm343_vm0, %v2053_v3  ;;  %2069 = vmatmul.msk.f32.gmra.mxu1 %vm343_vm0, %v2053_v3  ;;  %v1055_v3 = vld [vmem:[%s2463_s21 + $0x420] sm:$0xff] }
  0xea   : > { %2085 = vmatmul.msk.f32.gmra.mxu2 %vm343_vm0, %v2077_v7  ;;  %2093 = vmatmul.msk.f32.gmra.mxu3 %vm343_vm0, %v2077_v7 }
  0xeb   : > { %1362 = vmatpush.msrb.mxu0 %v1055_v3  ;;  %1405 = vmatpush.msrb.mxu1 %v1083_v15  ;;  %v974_v15 = vld [vmem:[%s2463_s21 + $0x198] sm:$0xff] }
  0xec   : > { %1446 = vmatpush.msrb.mxu2 %v1115_v16  ;;  %v1004_v16 = vld [vmem:[%s2463_s21 + $0x288] sm:$0xff] }
  0xed   : > { %1363 = vmatpush.msrb.mxu0 %v1053_v11  ;;  %v976_v11 = vld [vmem:[%s2463_s21 + $0x1a8] sm:$0xff] }
  0xef   : > { %1364 = vmatpush.msrb.mxu0 %v1051_v14  ;;  %v1038_v14 = vld [vmem:[%s2463_s21 + $0x398] sm:$0xff] }
  0xf1   : > { %2062 = vmatmul.msk.f32.gmra.mxu0 %vm343_vm0, %v2054_v13  ;;  %2070 = vmatmul.msk.f32.gmra.mxu1 %vm343_vm0, %v2054_v13  ;;  %v1149_v13 = vld [vmem:[%s2463_s21 + $0x710] sm:$0xff] }
  0xf2   : > { %2086 = vmatmul.msk.f32.gmra.mxu2 %vm343_vm0, %v2078_v17  ;;  %2094 = vmatmul.msk.f32.gmra.mxu3 %vm343_vm0, %v2078_v17  ;;  %v1147_v17 = vld [vmem:[%s2463_s21 + $0x700] sm:$0xff] }
  0xf3   : > { %1486 = vmatpush.msrb.mxu3 %v1149_v13  ;;  %v942_v13 = vld [vmem:[%s2463_s21 + $0x98] sm:$0xff] }
  0xf5   : > { %1487 = vmatpush.msrb.mxu3 %v1147_v17  ;;  %v940_v17 = vld [vmem:[%s2463_s21 + $0x88] sm:$0xff] }
  0xf6   : > { %v2703_v23 = vpop.f32.mrf.mxu0  ;;  %v2705_v24 = vpop.f32.mrf.mxu1 }
  0xf9   : > { %1201 = vmatmul.f32.vlgmr.msra.gmra.mxu0 %v2703_v23  ;;  %1242 = vmatmul.f32.vlgmr.msra.gmra.mxu1 %v2705_v24 }
  0xfa   : > { %1513 = vmatpush.msra.mxu0 %v954_v25  ;;  %1554 = vmatpush.msra.mxu1 %v986_v27 }
  0xfc   : > { %1514 = vmatpush.msra.mxu0 %v952_v29  ;;  %1555 = vmatpush.msra.mxu1 %v984_v39  ;;  %v972_v29 = vld [vmem:[%s2463_s21 + $0x188] sm:$0xff]  ;;  %v938_v39 = vld [vmem:[%s2463_s21 + $0x78] sm:$0xff] }
  0xfd   : > { %v2717_v33 = vpop.f32.mrf.mxu2  ;;  %v2719_v34 = vpop.f32.mrf.mxu3 }
  0xfe   : > { %1283 = vmatmul.f32.vlgmr.msra.gmra.mxu2 %v2717_v33  ;;  %1324 = vmatmul.f32.vlgmr.msra.gmra.mxu3 %v2719_v34  ;;  %v2723_v35 = vpop.f32.mrf.mxu0  ;;  %v2725_v36 = vpop.f32.mrf.mxu1 }
  0xff   : > { %1595 = vmatpush.msra.mxu2 %v1018_v22  ;;  %1636 = vmatpush.msra.mxu3 %v1050_v26  ;;  %v1036_v22 = vld [vmem:[%s2463_s21 + $0x388] sm:$0xff] }
 0x100   : > { %1515 = vmatpush.msra.mxu0 %v950_v41  ;;  %1556 = vmatpush.msra.mxu1 %v982_v43  ;;  %v970_v41 = vld [vmem:[%s2463_s21 + $0x178] sm:$0xff]  ;;  %v936_v43 = vld [vmem:[%s2463_s21 + $0x68] sm:$0xff] }
 0x101   : > { %1204 = vmatmul.f32.gmra.mxu0 %v2723_v35  ;;  %1245 = vmatmul.f32.gmra.mxu1 %v2725_v36 }
 0x102   : > { %1596 = vmatpush.msra.mxu2 %v1016_v28  ;;  %1637 = vmatpush.msra.mxu3 %v1048_v30  ;;  %v1002_v30 = vld [vmem:[%s2463_s21 + $0x278] sm:$0xff] }
 0x103   : > { %1516 = vmatpush.msra.mxu0 %v948_v49  ;;  %1557 = vmatpush.msra.mxu1 %v980_v55 }
 0x104   : > { %1597 = vmatpush.msra.mxu2 %v1014_v40  ;;  %1638 = vmatpush.msra.mxu3 %v1046_v42  ;;  %v1034_v40 = vld [vmem:[%s2463_s21 + $0x378] sm:$0xff]  ;;  %v1000_v42 = vld [vmem:[%s2463_s21 + $0x268] sm:$0xff] }
 0x105   : > { %v2737_v45 = vpop.f32.mrf.mxu2  ;;  %v2739_v46 = vpop.f32.mrf.mxu3  ;;  %1517 = vmatpush.msra.mxu0 %v946_v61  ;;  %1558 = vmatpush.msra.mxu1 %v978_v63  ;;  %v968_v61 = vld [vmem:[%s2463_s21 + $0x168] sm:$0xff]  ;;  %v934_v63 = vld [vmem:[%s2463_s21 + $0x58] sm:$0xff] }
 0x106   : > { %1286 = vmatmul.f32.gmra.mxu2 %v2737_v45  ;;  %1327 = vmatmul.f32.gmra.mxu3 %v2739_v46  ;;  %v2743_v47 = vpop.f32.mrf.mxu0  ;;  %v2745_v48 = vpop.f32.mrf.mxu1 }
 0x107   : > { %1598 = vmatpush.msra.mxu2 %v1012_v44  ;;  %1639 = vmatpush.msra.mxu3 %v1044_v50  ;;  %v1032_v44 = vld [vmem:[%s2463_s21 + $0x368] sm:$0xff] }
 0x108   : > { %1518 = vmatpush.msra.mxu0 %v944_v1  ;;  %1559 = vmatpush.msra.mxu1 %v976_v11  ;;  %v966_v1 = vld [vmem:[%s2463_s21 + $0x158] sm:$0xff]  ;;  %v932_v11 = vld [vmem:[%s2463_s21 + $0x48] sm:$0xff] }
 0x109   : > { %1207 = vmatmul.f32.gmra.mxu0 %v2743_v47  ;;  %1248 = vmatmul.f32.gmra.mxu1 %v2745_v48 }
 0x10a   : > { %1599 = vmatpush.msra.mxu2 %v1010_v56  ;;  %1640 = vmatpush.msra.mxu3 %v1042_v62  ;;  %v998_v62 = vld [vmem:[%s2463_s21 + $0x258] sm:$0xff] }
 0x10b   : > { %1519 = vmatpush.msra.mxu0 %v942_v13  ;;  %1560 = vmatpush.msra.mxu1 %v974_v15 }
 0x10c   : > { %1600 = vmatpush.msra.mxu2 %v1008_v0  ;;  %1641 = vmatpush.msra.mxu3 %v1040_v2  ;;  %v1030_v0 = vld [vmem:[%s2463_s21 + $0x358] sm:$0xff]  ;;  %v996_v2 = vld [vmem:[%s2463_s21 + $0x248] sm:$0xff] }
 0x10d   : > { %v2757_v57 = vpop.f32.mrf.mxu2  ;;  %v2759_v58 = vpop.f32.mrf.mxu3  ;;  %1520 = vmatpush.msra.mxu0 %v940_v17  ;;  %1561 = vmatpush.msra.mxu1 %v972_v29  ;;  %v964_v17 = vld [vmem:[%s2463_s21 + $0x148] sm:$0xff]  ;;  %v930_v29 = vld [vmem:[%s2463_s21 + $0x38] sm:$0xff] }
 0x10e   : > { %1289 = vmatmul.f32.gmra.mxu2 %v2757_v57  ;;  %1330 = vmatmul.f32.gmra.mxu3 %v2759_v58  ;;  %v2763_v59 = vpop.f32.mrf.mxu0  ;;  %v2765_v60 = vpop.f32.mrf.mxu1 }
 0x10f   : > { %1601 = vmatpush.msra.mxu2 %v1006_v12  ;;  %1642 = vmatpush.msra.mxu3 %v1038_v14  ;;  %v1028_v12 = vld [vmem:[%s2463_s21 + $0x348] sm:$0xff] }
 0x110   : > { %1521 = vmatpush.msra.mxu0 %v938_v39  ;;  %1562 = vmatpush.msra.mxu1 %v970_v41  ;;  %v962_v39 = vld [vmem:[%s2463_s21 + $0x138] sm:$0xff]  ;;  %v928_v41 = vld [vmem:[%s2463_s21 + $0x28] sm:$0xff] }
 0x111   : > { %1210 = vmatmul.f32.gmra.mxu0 %v2763_v59  ;;  %1251 = vmatmul.f32.gmra.mxu1 %v2765_v60 }
 0x112   : > { %1602 = vmatpush.msra.mxu2 %v1004_v16  ;;  %1643 = vmatpush.msra.mxu3 %v1036_v22  ;;  %v994_v22 = vld [vmem:[%s2463_s21 + $0x238] sm:$0xff] }
 0x113   : > { %1522 = vmatpush.msra.mxu0 %v936_v43  ;;  %1563 = vmatpush.msra.mxu1 %v968_v61  ;;  %v960_v43 = vld [vmem:[%s2463_s21 + $0x128] sm:$0xff] }
 0x114   : > { %1603 = vmatpush.msra.mxu2 %v1002_v30  ;;  %1644 = vmatpush.msra.mxu3 %v1034_v40  ;;  %v1026_v30 = vld [vmem:[%s2463_s21 + $0x338] sm:$0xff]  ;;  %v992_v40 = vld [vmem:[%s2463_s21 + $0x228] sm:$0xff] }
 0x115   : > { %v2778_v6 = vpop.f32.mrf.mxu2  ;;  %v2780_v7 = vpop.f32.mrf.mxu3  ;;  %1523 = vmatpush.msra.mxu0 %v934_v63  ;;  %1564 = vmatpush.msra.mxu1 %v966_v1  ;;  %v926_v1 = vld [vmem:[%s2463_s21 + $0x18] sm:$0xff] }
 0x116   : > { %1292 = vmatmul.f32.gmra.mxu2 %v2778_v6  ;;  %1333 = vmatmul.f32.gmra.mxu3 %v2780_v7  ;;  %v2784_v8 = vpop.f32.mrf.mxu0  ;;  %v2786_v9 = vpop.f32.mrf.mxu1 }
 0x117   : > { %1604 = vmatpush.msra.mxu2 %v1000_v42  ;;  %1645 = vmatpush.msra.mxu3 %v1032_v44  ;;  %v1024_v42 = vld [vmem:[%s2463_s21 + $0x328] sm:$0xff] }
 0x118   : > { %1524 = vmatpush.msra.mxu0 %v932_v11  ;;  %1565 = vmatpush.msra.mxu1 %v964_v17  ;;  %v924_v11 = vld [vmem:[%s2463_s21 + $0x8] sm:$0xff]  ;;  %v1022_v17 = vld [vmem:[%s2463_s21 + $0x318] sm:$0xff] }
 0x119   : > { %1213 = vmatmul.f32.gmra.mxu0 %v2784_v8  ;;  %1254 = vmatmul.f32.gmra.mxu1 %v2786_v9 }
 0x11a   : > { %1605 = vmatpush.msra.mxu2 %v998_v62  ;;  %1646 = vmatpush.msra.mxu3 %v1030_v0  ;;  %v990_v0 = vld [vmem:[%s2463_s21 + $0x218] sm:$0xff] }
 0x11b   : > { %1525 = vmatpush.msra.mxu0 %v930_v29  ;;  %1566 = vmatpush.msra.mxu1 %v962_v39  ;;  %v1020_v29 = vld [vmem:[%s2463_s21 + $0x308] sm:$0xff] }
 0x11c   : > { %1606 = vmatpush.msra.mxu2 %v996_v2  ;;  %1647 = vmatpush.msra.mxu3 %v1028_v12  ;;  %v958_v2 = vld [vmem:[%s2463_s21 + $0x118] sm:$0xff]  ;;  %v956_v12 = vld [vmem:[%s2463_s21 + $0x108] sm:$0xff] }
 0x11d   : > { %v2798_v18 = vpop.f32.mrf.mxu2  ;;  %v2800_v19 = vpop.f32.mrf.mxu3  ;;  %1526 = vmatpush.msra.mxu0 %v928_v41  ;;  %1567 = vmatpush.msra.mxu1 %v960_v43  ;;  %v1082_v43 = vld [vmem:[%s2463_s21 + $0x4f8] sm:$0xff] }
 0x11e   : > { %1295 = vmatmul.f32.gmra.mxu2 %v2798_v18  ;;  %1336 = vmatmul.f32.gmra.mxu3 %v2800_v19  ;;  %v2804_v20 = vpop.f32.mrf.mxu0  ;;  %v2806_v21 = vpop.f32.mrf.mxu1 }
 0x11f   : > { %1607 = vmatpush.msra.mxu2 %v994_v22  ;;  %1648 = vmatpush.msra.mxu3 %v1026_v30  ;;  %v988_v22 = vld [vmem:[%s2463_s21 + $0x208] sm:$0xff] }
 0x120   : > { %1527 = vmatpush.msra.mxu0 %v926_v1  ;;  %1568 = vmatpush.msra.mxu1 %v958_v2  ;;  %v1114_v1 = vld [vmem:[%s2463_s21 + $0x5f8] sm:$0xff]  ;;  %v1144_v2 = vld [vmem:[%s2463_s21 + $0x6e8] sm:$0xff] }
 0x121   : > { %1216 = vmatmul.f32.gmra.mxu0 %v2804_v20  ;;  %1257 = vmatmul.f32.gmra.mxu1 %v2806_v21 }
 0x122   : > { %1608 = vmatpush.msra.mxu2 %v992_v40  ;;  %1649 = vmatpush.msra.mxu3 %v1024_v42  ;;  %v1146_v42 = vld [vmem:[%s2463_s21 + $0x6f8] sm:$0xff] }
 0x123   : > { %1528 = vmatpush.msra.mxu0 %v924_v11  ;;  %1569 = vmatpush.msra.mxu1 %v956_v12  ;;  %v1080_v11 = vld [vmem:[%s2463_s21 + $0x4e8] sm:$0xff] }
 0x124   : > { %1609 = vmatpush.msra.mxu2 %v990_v0  ;;  %1650 = vmatpush.msra.mxu3 %v1022_v17  ;;  %v1178_v0 = vld [vmem:[%s2463_s21 + $0x7f8] sm:$0xff] }
 0x125   : > { %v2817_v31 = vpop.f32.mrf.mxu2  ;;  %v2819_v32 = vpop.f32.mrf.mxu3 }
 0x126   : > { %1298 = vmatmul.f32.gmra.mxu2 %v2817_v31  ;;  %1339 = vmatmul.f32.gmra.mxu3 %v2819_v32  ;;  %v2823_v37 = vpop.f32.mrf.mxu0  ;;  %v2825_v38 = vpop.f32.mrf.mxu1 }
 0x127   : > { %1610 = vmatpush.msra.mxu2 %v988_v22  ;;  %1651 = vmatpush.msra.mxu3 %v1020_v29  ;;  %v1176_v22 = vld [vmem:[%s2463_s21 + $0x7e8] sm:$0xff] }
 0x129   : > { %1219 = vmatmul.f32.gmra.mxu0 %v2823_v37  ;;  %1260 = vmatmul.f32.gmra.mxu1 %v2825_v38 }
 0x12d   : > { %v2837_v51 = vpop.f32.mrf.mxu2  ;;  %v2839_v52 = vpop.f32.mrf.mxu3 }
 0x12e   : > { %1301 = vmatmul.f32.gmra.mxu2 %v2837_v51  ;;  %1342 = vmatmul.f32.gmra.mxu3 %v2839_v52  ;;  %v2843_v53 = vpop.f32.mrf.mxu0  ;;  %v2845_v54 = vpop.f32.mrf.mxu1 }
 0x131   : > { %1222 = vmatmul.f32.gmra.mxu0 %v2843_v53  ;;  %1263 = vmatmul.f32.gmra.mxu1 %v2845_v54 }
 0x135   : > { %v2857_v3 = vpop.f32.mrf.mxu2  ;;  %v2859_v4 = vpop.f32.mrf.mxu3 }
 0x136   : > { %1304 = vmatmul.f32.gmra.mxu2 %v2857_v3  ;;  %1345 = vmatmul.f32.gmra.mxu3 %v2859_v4  ;;  %v2863_v5 = vpop.f32.mrf.mxu0  ;;  %v2865_v10 = vpop.f32.mrf.mxu1 }
 0x139   : > { %1365 = vmatmul.f32.vlgmr.msrb.gmra.mxu0 %v2863_v5  ;;  %1406 = vmatmul.f32.vlgmr.msrb.gmra.mxu1 %v2865_v10 }
 0x13a   : > { %1677 = vmatpush.msrb.mxu0 %v1082_v43  ;;  %1718 = vmatpush.msrb.mxu1 %v1114_v1  ;;  %v1112_v43 = vld [vmem:[%s2463_s21 + $0x5e8] sm:$0xff]  ;;  %v1078_v1 = vld [vmem:[%s2463_s21 + $0x4d8] sm:$0xff] }
 0x13c   : > { %1678 = vmatpush.msrb.mxu0 %v1080_v11  ;;  %1719 = vmatpush.msrb.mxu1 %v1112_v43 }
 0x13d   : > { %v2877_v25 = vpop.f32.mrf.mxu2  ;;  %v2879_v26 = vpop.f32.mrf.mxu3 }
 0x13e   : > { %1447 = vmatmul.f32.vlgmr.msrb.gmra.mxu2 %v2877_v25  ;;  %1488 = vmatmul.f32.vlgmr.msrb.gmra.mxu3 %v2879_v26  ;;  %v2883_v27 = vpop.f32.mrf.mxu0  ;;  %v2885_v28 = vpop.f32.mrf.mxu1 }
 0x13f   : > { %1759 = vmatpush.msrb.mxu2 %v1146_v42  ;;  %1800 = vmatpush.msrb.mxu3 %v1178_v0  ;;  %v1142_v0 = vld [vmem:[%s2463_s21 + $0x6d8] sm:$0xff] }
 0x140   : > { %1679 = vmatpush.msrb.mxu0 %v1078_v1  ;;  %v1108_v1 = vld [vmem:[%s2463_s21 + $0x5c8] sm:$0xff] }
 0x141   : > { %1368 = vmatmul.f32.gmra.mxu0 %v2883_v27  ;;  %1409 = vmatmul.f32.gmra.mxu1 %v2885_v28 }
 0x142   : > { %1760 = vmatpush.msrb.mxu2 %v1144_v2  ;;  %1801 = vmatpush.msrb.mxu3 %v1176_v22  ;;  %v1174_v2 = vld [vmem:[%s2463_s21 + $0x7d8] sm:$0xff]  ;;  %v1172_v22 = vld [vmem:[%s2463_s21 + $0x7c8] sm:$0xff] }
 0x144   : > { %1761 = vmatpush.msrb.mxu2 %v1142_v0  ;;  %1802 = vmatpush.msrb.mxu3 %v1174_v2  ;;  %v1138_v2 = vld [vmem:[%s2463_s21 + $0x6b8] sm:$0xff] }
 0x145   : > { %v2897_v49 = vpop.f32.mrf.mxu2  ;;  %v2899_v50 = vpop.f32.mrf.mxu3 }
 0x146   : > { %1450 = vmatmul.f32.gmra.mxu2 %v2897_v49  ;;  %1491 = vmatmul.f32.gmra.mxu3 %v2899_v50  ;;  %v2903_v55 = vpop.f32.mrf.mxu0  ;;  %v2905_v56 = vpop.f32.mrf.mxu1 }
 0x147   : > { %1803 = vmatpush.msrb.mxu3 %v1172_v22  ;;  %v1168_v22 = vld [vmem:[%s2463_s21 + $0x7a8] sm:$0xff] }
 0x149   : > { %1371 = vmatmul.f32.gmra.mxu0 %v2903_v55  ;;  %1412 = vmatmul.f32.gmra.mxu1 %v2905_v56 }
 0x14d   : > { %v2917_v13 = vpop.f32.mrf.mxu2  ;;  %v2919_v14 = vpop.f32.mrf.mxu3 }
 0x14e   : > { %1453 = vmatmul.f32.gmra.mxu2 %v2917_v13  ;;  %1494 = vmatmul.f32.gmra.mxu3 %v2919_v14  ;;  %v2923_v15 = vpop.f32.mrf.mxu0  ;;  %v2925_v16 = vpop.f32.mrf.mxu1 }
 0x151   : > { %1374 = vmatmul.f32.gmra.mxu0 %v2923_v15  ;;  %1415 = vmatmul.f32.gmra.mxu1 %v2925_v16 }
 0x155   : > { %v2938_v44 = vpop.f32.mrf.mxu2  ;;  %v2940_v61 = vpop.f32.mrf.mxu3 }
 0x156   : > { %1456 = vmatmul.f32.gmra.mxu2 %v2938_v44  ;;  %1497 = vmatmul.f32.gmra.mxu3 %v2940_v61  ;;  %v2944_v62 = vpop.f32.mrf.mxu0  ;;  %v2946_v63 = vpop.f32.mrf.mxu1 }
 0x159   : > { %1377 = vmatmul.f32.gmra.mxu0 %v2944_v62  ;;  %1418 = vmatmul.f32.gmra.mxu1 %v2946_v63 }
 0x15d   : > { %v2958_v30 = vpop.f32.mrf.mxu2  ;;  %v2960_v39 = vpop.f32.mrf.mxu3 }
 0x15e   : > { %1459 = vmatmul.f32.gmra.mxu2 %v2958_v30  ;;  %1500 = vmatmul.f32.gmra.mxu3 %v2960_v39  ;;  %v2964_v40 = vpop.f32.mrf.mxu0  ;;  %v2966_v41 = vpop.f32.mrf.mxu1 }
 0x15f   : > { %3416 = vst [vmem:[#allocation11_spill] sm:$0xff] %v2964_v40 }
 0x160   : > { %3417 = vst [vmem:[#allocation12_spill] sm:$0xff] %v2966_v41 }
 0x161   : > { %1380 = vmatmul.f32.gmra.mxu0 %v2964_v40  ;;  %1421 = vmatmul.f32.gmra.mxu1 %v2966_v41  ;;  %v1076_v41 = vld [vmem:[%s2463_s21 + $0x4c8] sm:$0xff] }
 0x162   : > { %1680 = vmatpush.msrb.mxu0 %v1076_v41 }
 0x165   : > { %v2976_v12 = vpop.f32.mrf.mxu2  ;;  %v2978_v17 = vpop.f32.mrf.mxu3 }
 0x166   : > { %3418 = vst [vmem:[#allocation13_spill] sm:$0xff] %v2976_v12  ;;  %1462 = vmatmul.f32.gmra.mxu2 %v2976_v12  ;;  %1503 = vmatmul.f32.gmra.mxu3 %v2978_v17  ;;  %v2983_v29 = vpop.f32.mrf.mxu0  ;;  %v2985_v42 = vpop.f32.mrf.mxu1  ;;  %v1140_v12 = vld [vmem:[%s2463_s21 + $0x6c8] sm:$0xff] }
 0x167   : > { %3419 = vst [vmem:[#allocation14_spill] sm:$0xff] %v2978_v17  ;;  %v1110_v17 = vld [vmem:[%s2463_s21 + $0x5d8] sm:$0xff]  ;;  %1762 = vmatpush.msrb.mxu2 %v1140_v12 }
 0x168   : > { %3420 = vst [vmem:[#allocation15_spill] sm:$0xff] %v2983_v29  ;;  %1720 = vmatpush.msrb.mxu1 %v1110_v17  ;;  %v1074_v12 = vld [vmem:[%s2463_s21 + $0x4b8] sm:$0xff] }
 0x169   : > { %3421 = vst [vmem:[#allocation16_spill] sm:$0xff] %v2985_v42  ;;  %1383 = vmatmul.f32.gmra.mxu0 %v2983_v29  ;;  %1424 = vmatmul.f32.gmra.mxu1 %v2985_v42  ;;  %v1170_v17 = vld [vmem:[%s2463_s21 + $0x7b8] sm:$0xff]  ;;  %v1072_v42 = vld [vmem:[%s2463_s21 + $0x4a8] sm:$0xff] }
 0x16a   : > { %1721 = vmatpush.msrb.mxu1 %v1108_v1  ;;  %1763 = vmatpush.msrb.mxu2 %v1138_v2 }
 0x16b   : > { %1681 = vmatpush.msrb.mxu0 %v1074_v12  ;;  %1804 = vmatpush.msrb.mxu3 %v1170_v17  ;;  %v1104_v12 = vld [vmem:[%s2463_s21 + $0x5a8] sm:$0xff]  ;;  %v1134_v17 = vld [vmem:[%s2463_s21 + $0x698] sm:$0xff] }
 0x16d   : > { %v2996_v40 = vpop.f32.mrf.mxu2  ;;  %v2998_v11 = vpop.f32.mrf.mxu3  ;;  %1682 = vmatpush.msrb.mxu0 %v1072_v42  ;;  %1805 = vmatpush.msrb.mxu3 %v1168_v22  ;;  %v1164_v42 = vld [vmem:[%s2463_s21 + $0x788] sm:$0xff] }
 0x16e   : > { %3422 = vst [vmem:[#allocation17_spill] sm:$0xff] %v2996_v40  ;;  %1465 = vmatmul.f32.gmra.mxu2 %v2996_v40  ;;  %1506 = vmatmul.f32.gmra.mxu3 %v2998_v11  ;;  %v3003_v43 = vpop.f32.mrf.mxu0  ;;  %v3005_v0 = vpop.f32.mrf.mxu1  ;;  %v1136_v40 = vld [vmem:[%s2463_s21 + $0x6a8] sm:$0xff] }
 0x16f   : > { %3423 = vst [vmem:[#allocation18_spill] sm:$0xff] %v2998_v11  ;;  %v1106_v11 = vld [vmem:[%s2463_s21 + $0x5b8] sm:$0xff]  ;;  %1764 = vmatpush.msrb.mxu2 %v1136_v40  ;;  %v1100_v22 = vld [vmem:[%s2463_s21 + $0x588] sm:$0xff] }
 0x170   : > { %3424 = vst [vmem:[#allocation19_spill] sm:$0xff] %v3005_v0  ;;  %1722 = vmatpush.msrb.mxu1 %v1106_v11  ;;  %v1070_v40 = vld [vmem:[%s2463_s21 + $0x498] sm:$0xff] }
 0x171   : > { %1386 = vmatmul.f32.gmra.mxu0 %v3003_v43  ;;  %1427 = vmatmul.f32.gmra.mxu1 %v3005_v0  ;;  %v1166_v11 = vld [vmem:[%s2463_s21 + $0x798] sm:$0xff]  ;;  %v1068_v0 = vld [vmem:[%s2463_s21 + $0x488] sm:$0xff] }
 0x172   : > { %1723 = vmatpush.msrb.mxu1 %v1104_v12  ;;  %1765 = vmatpush.msrb.mxu2 %v1134_v17  ;;  %v1130_v12 = vld [vmem:[%s2463_s21 + $0x678] sm:$0xff] }
 0x173   : > { %1683 = vmatpush.msrb.mxu0 %v1070_v40  ;;  %1806 = vmatpush.msrb.mxu3 %v1166_v11  ;;  %v1098_v17 = vld [vmem:[%s2463_s21 + $0x578] sm:$0xff]  ;;  %v1064_v40 = vld [vmem:[%s2463_s21 + $0x468] sm:$0xff] }
 0x174   : > { %v1160_v11 = vld [vmem:[%s2463_s21 + $0x768] sm:$0xff] }
 0x175   : > { %v3016_v29 = vpop.f32.mrf.mxu2  ;;  %v3018_v41 = vpop.f32.mrf.mxu3  ;;  %1684 = vmatpush.msrb.mxu0 %v1068_v0  ;;  %1807 = vmatpush.msrb.mxu3 %v1164_v42  ;;  %v1128_v0 = vld [vmem:[%s2463_s21 + $0x668] sm:$0xff] }
 0x176   : > { %3425 = vst [vmem:[#allocation20_spill] sm:$0xff] %v3016_v29  ;;  %1468 = vmatmul.f32.gmra.mxu2 %v3016_v29  ;;  %1509 = vmatmul.f32.gmra.mxu3 %v3018_v41  ;;  %v3023_v1 = vpop.f32.mrf.mxu0  ;;  %v3025_v2 = vpop.f32.mrf.mxu1  ;;  %v1132_v29 = vld [vmem:[%s2463_s21 + $0x688] sm:$0xff] }
 0x177   : > { %3426 = vst [vmem:[#allocation21_spill] sm:$0xff] %v3018_v41  ;;  %v1102_v41 = vld [vmem:[%s2463_s21 + $0x598] sm:$0xff]  ;;  %1766 = vmatpush.msrb.mxu2 %v1132_v29  ;;  %v1096_v42 = vld [vmem:[%s2463_s21 + $0x568] sm:$0xff] }
 0x178   : > { %1724 = vmatpush.msrb.mxu1 %v1102_v41 }
 0x179   : > { %1529 = vmatmul.f32.vlgmr.msra.gmra.mxu0 %v2703_v23  ;;  %1570 = vmatmul.f32.vlgmr.msra.gmra.mxu1 %v2705_v24 }
 0x17a   : > { %1725 = vmatpush.msrb.mxu1 %v1100_v22  ;;  %1767 = vmatpush.msrb.mxu2 %v1130_v12  ;;  %v1126_v22 = vld [vmem:[%s2463_s21 + $0x658] sm:$0xff] }
 0x17c   : > { %1726 = vmatpush.msrb.mxu1 %v1098_v17  ;;  %1768 = vmatpush.msrb.mxu2 %v1128_v0  ;;  %v1124_v17 = vld [vmem:[%s2463_s21 + $0x648] sm:$0xff] }
 0x17d   : > { %v1060_v0 = vld [vmem:[%s2463_s21 + $0x448] sm:$0xff] }
 0x17e   : > { %1611 = vmatmul.f32.vlgmr.msra.gmra.mxu2 %v2717_v33  ;;  %1652 = vmatmul.f32.vlgmr.msra.gmra.mxu3 %v2719_v34  ;;  %v3039_v23 = vpop.f32.mrf.mxu0  ;;  %v3041_v24 = vpop.f32.mrf.mxu1  ;;  %v1066_v33 = vld [vmem:[%s2463_s21 + $0x478] sm:$0xff] }
 0x17f   : > { %v1162_v34 = vld [vmem:[%s2463_s21 + $0x778] sm:$0xff]  ;;  %1685 = vmatpush.msrb.mxu0 %v1066_v33  ;;  %1727 = vmatpush.msrb.mxu1 %v1096_v42 }
 0x180   : > { %1808 = vmatpush.msrb.mxu3 %v1162_v34  ;;  %1769 = vmatpush.msrb.mxu2 %v1126_v22  ;;  %v1094_v34 = vld [vmem:[%s2463_s21 + $0x558] sm:$0xff] }
 0x181   : > { %v3045_v29 = vpop.f32.mrf.mxu2  ;;  %v3047_v41 = vpop.f32.mrf.mxu3  ;;  %1532 = vmatmul.f32.gmra.mxu0 %v2723_v35  ;;  %1573 = vmatmul.f32.gmra.mxu1 %v2725_v36  ;;  %v1122_v42 = vld [vmem:[%s2463_s21 + $0x638] sm:$0xff] }
 0x182   : > { %1686 = vmatpush.msrb.mxu0 %v1064_v40  ;;  %1809 = vmatpush.msrb.mxu3 %v1160_v11  ;;  %v1156_v40 = vld [vmem:[%s2463_s21 + $0x748] sm:$0xff] }
 0x183   : > { %1728 = vmatpush.msrb.mxu1 %v1094_v34  ;;  %1770 = vmatpush.msrb.mxu2 %v1124_v17  ;;  %v1092_v11 = vld [vmem:[%s2463_s21 + $0x548] sm:$0xff] }
 0x184   : > { %v1120_v34 = vld [vmem:[%s2463_s21 + $0x628] sm:$0xff] }
 0x185   : > { %1729 = vmatpush.msrb.mxu1 %v1092_v11  ;;  %1771 = vmatpush.msrb.mxu2 %v1122_v42  ;;  %v1056_v17 = vld [vmem:[%s2463_s21 + $0x428] sm:$0xff]  ;;  %v1118_v11 = vld [vmem:[%s2463_s21 + $0x618] sm:$0xff] }
 0x186   : > { %1614 = vmatmul.f32.gmra.mxu2 %v2737_v45  ;;  %1655 = vmatmul.f32.gmra.mxu3 %v2739_v46  ;;  %v3059_v35 = vpop.f32.mrf.mxu0  ;;  %v3061_v36 = vpop.f32.mrf.mxu1  ;;  %v1062_v45 = vld [vmem:[%s2463_s21 + $0x458] sm:$0xff] }
 0x187   : > { %v1158_v46 = vld [vmem:[%s2463_s21 + $0x758] sm:$0xff]  ;;  %1687 = vmatpush.msrb.mxu0 %v1062_v45  ;;  %1772 = vmatpush.msrb.mxu2 %v1120_v34  ;;  %v1084_v34 = vld [vmem:[%s2463_s21 + $0x508] sm:$0xff] }
 0x188   : > { %1810 = vmatpush.msrb.mxu3 %v1158_v46  ;;  %v1154_v45 = vld [vmem:[%s2463_s21 + $0x738] sm:$0xff] }
 0x189   : > { %v3065_v12 = vpop.f32.mrf.mxu2  ;;  %v3067_v33 = vpop.f32.mrf.mxu3  ;;  %1535 = vmatmul.f32.gmra.mxu0 %v2743_v47  ;;  %1576 = vmatmul.f32.gmra.mxu1 %v2745_v48  ;;  %v1090_v46 = vld [vmem:[%s2463_s21 + $0x538] sm:$0xff] }
 0x18a   : > { %1688 = vmatpush.msrb.mxu0 %v1060_v0  ;;  %1811 = vmatpush.msrb.mxu3 %v1156_v40  ;;  %v1152_v0 = vld [vmem:[%s2463_s21 + $0x728] sm:$0xff]  ;;  %v1054_v42 = vld [vmem:[%s2463_s21 + $0x418] sm:$0xff] }
 0x18b   : > { %1730 = vmatpush.msrb.mxu1 %v1090_v46  ;;  %v1088_v40 = vld [vmem:[%s2463_s21 + $0x528] sm:$0xff]  ;;  %1773 = vmatpush.msrb.mxu2 %v1118_v11 }
 0x18c   : > { %1812 = vmatpush.msrb.mxu3 %v1154_v45  ;;  %v1052_v45 = vld [vmem:[%s2463_s21 + $0x408] sm:$0xff] }
 0x18d   : > { %1731 = vmatpush.msrb.mxu1 %v1088_v40 }
 0x18e   : > { %1617 = vmatmul.f32.gmra.mxu2 %v2757_v57  ;;  %1658 = vmatmul.f32.gmra.mxu3 %v2759_v58  ;;  %v3079_v47 = vpop.f32.mrf.mxu0  ;;  %v3081_v48 = vpop.f32.mrf.mxu1  ;;  %v1058_v58 = vld [vmem:[%s2463_s21 + $0x438] sm:$0xff] }
 0x18f   : > { %1689 = vmatpush.msrb.mxu0 %v1058_v58  ;;  %1813 = vmatpush.msrb.mxu3 %v1152_v0  ;;  %v1086_v58 = vld [vmem:[%s2463_s21 + $0x518] sm:$0xff]  ;;  %v1148_v0 = vld [vmem:[%s2463_s21 + $0x708] sm:$0xff] }
 0x190   : > { %1732 = vmatpush.msrb.mxu1 %v1086_v58 }
 0x191   : > { %v3085_v22 = vpop.f32.mrf.mxu2  ;;  %v3087_v57 = vpop.f32.mrf.mxu3  ;;  %1538 = vmatmul.f32.gmra.mxu0 %v2763_v59  ;;  %1579 = vmatmul.f32.gmra.mxu1 %v2765_v60 }
 0x192   : > { %1690 = vmatpush.msrb.mxu0 %v1056_v17  ;;  %1733 = vmatpush.msrb.mxu1 %v1084_v34  ;;  %v1116_v17 = vld [vmem:[%s2463_s21 + $0x608] sm:$0xff] }
 0x193   : > { %1774 = vmatpush.msrb.mxu2 %v1116_v17 }
 0x194   : > { %1691 = vmatpush.msrb.mxu0 %v1054_v42 }
 0x196   : > { %1620 = vmatmul.f32.gmra.mxu2 %v2778_v6  ;;  %1661 = vmatmul.f32.gmra.mxu3 %v2780_v7  ;;  %v3100_v59 = vpop.f32.mrf.mxu0  ;;  %v3102_v60 = vpop.f32.mrf.mxu1  ;;  %v1150_v7 = vld [vmem:[%s2463_s21 + $0x718] sm:$0xff] }
 0x197   : > { %1814 = vmatpush.msrb.mxu3 %v1150_v7  ;;  %1692 = vmatpush.msrb.mxu0 %v1052_v45 }
 0x199   : > { %v3108_v46 = vpop.f32.mrf.mxu2  ;;  %v3110_v6 = vpop.f32.mrf.mxu3  ;;  %1541 = vmatmul.f32.gmra.mxu0 %v2784_v8  ;;  %1582 = vmatmul.f32.gmra.mxu1 %v2786_v9 }
 0x19a   : > { %1815 = vmatpush.msrb.mxu3 %v1148_v0 }
 0x19e   : > { %1623 = vmatmul.f32.gmra.mxu2 %v2798_v18  ;;  %1664 = vmatmul.f32.gmra.mxu3 %v2800_v19  ;;  %v3120_v40 = vpop.f32.mrf.mxu0  ;;  %v3122_v8 = vpop.f32.mrf.mxu1  ;;  %v3137_v19 = vld [vmem:[%s2469_s22] sm:$0x3] }
 0x1a1   : > { %v3124_v9 = vpop.f32.mrf.mxu2  ;;  %v3126_v11 = vpop.f32.mrf.mxu3  ;;  %1544 = vmatmul.f32.gmra.mxu0 %v2804_v20  ;;  %1585 = vmatmul.f32.gmra.mxu1 %v2806_v21  ;;  %v3146_v20 = vperm.slane %v3137_v19, 0 }
 0x1a6   : > { %1626 = vmatmul.f32.gmra.mxu2 %v2817_v31  ;;  %1667 = vmatmul.f32.gmra.mxu3 %v2819_v32  ;;  %v3132_v42 = vpop.f32.mrf.mxu0  ;;  %v3134_v18 = vpop.f32.mrf.mxu1  ;;  %v1203_v32 = vadd.f32 %v3023_v1, %v3146_v20  ;;  %v1206_v1 = vadd.f32 %v3039_v23, %v3146_v20 }
 0x1a9   : > { %v3139_v58 = vpop.f32.mrf.mxu2  ;;  %v3141_v45 = vpop.f32.mrf.mxu3  ;;  %1547 = vmatmul.f32.gmra.mxu0 %v2823_v37  ;;  %1588 = vmatmul.f32.gmra.mxu1 %v2825_v38  ;;  %v1244_v37 = vadd.f32 %v3025_v2, %v1203_v32 }
 0x1ab   : > { %v1285_v38 = vadd.f32 %v3045_v29, %v1244_v37  ;;  %v1209_v29 = vadd.f32 %v3059_v35, %v3146_v20 }
 0x1ae   : > { %1629 = vmatmul.f32.gmra.mxu2 %v2837_v51  ;;  %1670 = vmatmul.f32.gmra.mxu3 %v2839_v52  ;;  %v3150_v21 = vpop.f32.mrf.mxu0  ;;  %v3152_v31 = vpop.f32.mrf.mxu1 }
 0x1b1   : > { %v3156_v7 = vpop.f32.mrf.mxu2  ;;  %v3158_v34 = vpop.f32.mrf.mxu3  ;;  %1550 = vmatmul.f32.gmra.mxu0 %v2843_v53  ;;  %1591 = vmatmul.f32.gmra.mxu1 %v2845_v54  ;;  %v1326_v53 = vadd.f32 %v3047_v41, %v1285_v38  ;;  %v1247_v54 = vadd.f32 %v3041_v24, %v1206_v1  ;;  %v1250_v41 = vadd.f32 %v3061_v36, %v1209_v29 }
 0x1b6   : > { %1632 = vmatmul.f32.gmra.mxu2 %v2857_v3  ;;  %1673 = vmatmul.f32.gmra.mxu3 %v2859_v4  ;;  %v1366_v51 = vpop.f32.mrf.mxu0  ;;  %v1407_v52 = vpop.f32.mrf.mxu1  ;;  %v1288_v4 = vadd.f32 %v3065_v12, %v1247_v54 }
 0x1b7   : > { %v1367_v3 = vadd.f32 %v1366_v51, %v1326_v53 }
 0x1b9   : > { %v3168_v17 = vpop.f32.mrf.mxu2  ;;  %v3170_v0 = vpop.f32.mrf.mxu3  ;;  %1693 = vmatmul.f32.vlgmr.msrb.gmra.mxu0 %v2863_v5  ;;  %1734 = vmatmul.f32.vlgmr.msrb.gmra.mxu1 %v2865_v10  ;;  %v1408_v32 = vadd.f32 %v1407_v52, %v1367_v3  ;;  %v1329_v10 = vadd.f32 %v3067_v33, %v1288_v4 }
 0x1be   : > { %1775 = vmatmul.f32.vlgmr.msrb.gmra.mxu2 %v2877_v25  ;;  %1816 = vmatmul.f32.vlgmr.msrb.gmra.mxu3 %v2879_v26  ;;  %v1369_v2 = vpop.f32.mrf.mxu0  ;;  %v1410_v23 = vpop.f32.mrf.mxu1  ;;  %v1291_v26 = vadd.f32 %v3085_v22, %v1250_v41 }
 0x1bf   : > { %v1370_v25 = vadd.f32 %v1369_v2, %v1329_v10 }
 0x1c0   : > { %v1332_v22 = vadd.f32 %v3087_v57, %v1291_v26  ;;  %v3428_v26 = vld [vmem:[#allocation12_spill] sm:$0xff] }
 0x1c1   : > { %v1448_v5 = vpop.f32.mrf.mxu2  ;;  %v1489_v37 = vpop.f32.mrf.mxu3  ;;  %1696 = vmatmul.f32.gmra.mxu0 %v2883_v27  ;;  %1737 = vmatmul.f32.gmra.mxu1 %v2885_v28  ;;  %v1212_v28 = vadd.f32 %v3079_v47, %v3146_v20  ;;  %v1411_v33 = vadd.f32 %v1410_v23, %v1370_v25  ;;  %v3427_v25 = vld [vmem:[#allocation11_spill] sm:$0xff] }
 0x1c2   : > { %v1449_v24 = vadd.f32 %v1448_v5, %v1408_v32 }
 0x1c4   : > { %v3185_v12 = vadd.f32 %v1489_v37, %v1449_v24 }
 0x1c6   : > { %v1841_v38 = vmax.f32 %v3185_v12, 0.0  ;;  %1778 = vmatmul.f32.gmra.mxu2 %v2897_v49  ;;  %1819 = vmatmul.f32.gmra.mxu3 %v2899_v50  ;;  %v1372_v35 = vpop.f32.mrf.mxu0  ;;  %v1413_v27 = vpop.f32.mrf.mxu1  ;;  %v1253_v49 = vadd.f32 %v3081_v48, %v1212_v28  ;;  %v3429_v28 = vld [vmem:[#allocation13_spill] sm:$0xff] }
 0x1c7   : > { %v1373_v1 = vadd.f32 %v1372_v35, %v1332_v22  ;;  %v1224_v22 = vadd.f32 %v3150_v21, %v3146_v20  ;;  %v3433_v21 = vld [vmem:[#allocation17_spill] sm:$0xff] }
 0x1c8   : > { %1857 = vst [vmem:[#allocation2 + $0x30] sm:$0xff] %v1841_v38  ;;  %v1294_v53 = vadd.f32 %v3108_v46, %v1253_v49  ;;  %v3431_v49 = vld [vmem:[#allocation15_spill] sm:$0xff] }
 0x1c9   : > { %v1451_v51 = vpop.f32.mrf.mxu2  ;;  %v1492_v36 = vpop.f32.mrf.mxu3  ;;  %1699 = vmatmul.f32.gmra.mxu0 %v2903_v55  ;;  %1740 = vmatmul.f32.gmra.mxu1 %v2905_v56  ;;  %v1215_v56 = vadd.f32 %v3100_v59, %v3146_v20  ;;  %v1414_v57 = vadd.f32 %v1413_v27, %v1373_v1  ;;  %v3432_v1 = vld [vmem:[#allocation16_spill] sm:$0xff] }
 0x1ca   : > { %v1452_v52 = vadd.f32 %v1451_v51, %v1411_v33  ;;  %v1335_v46 = vadd.f32 %v3110_v6, %v1294_v53  ;;  %v3430_v33 = vld [vmem:[#allocation14_spill] sm:$0xff] }
 0x1cc   : > { %v3197_v50 = vadd.f32 %v1492_v36, %v1452_v52 }
 0x1ce   : > { %v1843_v47 = vmax.f32 %v3197_v50, 0.0  ;;  %1781 = vmatmul.f32.gmra.mxu2 %v2917_v13  ;;  %1822 = vmatmul.f32.gmra.mxu3 %v2919_v14  ;;  %v1375_v54 = vpop.f32.mrf.mxu0  ;;  %v1416_v55 = vpop.f32.mrf.mxu1  ;;  %v1256_v13 = vadd.f32 %v3102_v60, %v1215_v56 }
 0x1cf   : > { %v1376_v2 = vadd.f32 %v1375_v54, %v1335_v46 }
 0x1d0   : > { %1859 = vst [vmem:[#allocation2 + $0x58] sm:$0xff] %v1843_v47  ;;  %v1297_v23 = vadd.f32 %v3124_v9, %v1256_v13  ;;  %v1265_v47 = vadd.f32 %v3152_v31, %v1224_v22  ;;  %v3435_v31 = vld [vmem:[#allocation19_spill] sm:$0xff] }
 0x1d1   : > { %v1454_v3 = vpop.f32.mrf.mxu2  ;;  %v1495_v48 = vpop.f32.mrf.mxu3  ;;  %1702 = vmatmul.f32.gmra.mxu0 %v2923_v15  ;;  %1743 = vmatmul.f32.gmra.mxu1 %v2925_v16  ;;  %v1218_v16 = vadd.f32 %v3120_v40, %v3146_v20  ;;  %v1417_v6 = vadd.f32 %v1416_v55, %v1376_v2 }
 0x1d2   : > { %v1455_v4 = vadd.f32 %v1454_v3, %v1414_v57  ;;  %v1338_v9 = vadd.f32 %v3126_v11, %v1297_v23  ;;  %v1306_v56 = vadd.f32 %v3168_v17, %v1265_v47  ;;  %v3434_v57 = vld [vmem:[#allocation18_spill] sm:$0xff] }
 0x1d4   : > { %v3209_v14 = vadd.f32 %v1495_v48, %v1455_v4  ;;  %v1347_v13 = vadd.f32 %v3170_v0, %v1306_v56 }
 0x1d6   : > { %v1845_v59 = vmax.f32 %v3209_v14, 0.0  ;;  %1784 = vmatmul.f32.gmra.mxu2 %v2938_v44  ;;  %1825 = vmatmul.f32.gmra.mxu3 %v2940_v61  ;;  %v1378_v29 = vpop.f32.mrf.mxu0  ;;  %v1419_v15 = vpop.f32.mrf.mxu1  ;;  %v1259_v44 = vadd.f32 %v3122_v8, %v1218_v16 }
 0x1d7   : > { %v1379_v37 = vadd.f32 %v1378_v29, %v1338_v9  ;;  %v3436_v29 = vld [vmem:[#allocation20_spill] sm:$0xff] }
 0x1d8   : > { %1861 = vst [vmem:[#allocation2 + $0x50] sm:$0xff] %v1845_v59  ;;  %v1300_v10 = vadd.f32 %v3139_v58, %v1259_v44 }
 0x1d9   : > { %v1457_v32 = vpop.f32.mrf.mxu2  ;;  %v1498_v60 = vpop.f32.mrf.mxu3  ;;  %1705 = vmatmul.f32.gmra.mxu0 %v2944_v62  ;;  %1746 = vmatmul.f32.gmra.mxu1 %v2946_v63  ;;  %v1221_v63 = vadd.f32 %v3132_v42, %v3146_v20  ;;  %v1420_v11 = vadd.f32 %v1419_v15, %v1379_v37  ;;  %v3437_v15 = vld [vmem:[#allocation21_spill] sm:$0xff] }
 0x1da   : > { %v1458_v5 = vadd.f32 %v1457_v32, %v1417_v6  ;;  %v1341_v58 = vadd.f32 %v3141_v45, %v1300_v10 }
 0x1dc   : > { %v3221_v61 = vadd.f32 %v1498_v60, %v1458_v5 }
 0x1de   : > { %v1847_v40 = vmax.f32 %v3221_v61, 0.0  ;;  %1787 = vmatmul.f32.gmra.mxu2 %v2958_v30  ;;  %1828 = vmatmul.f32.gmra.mxu3 %v2960_v39  ;;  %v1381_v24 = vpop.f32.mrf.mxu0  ;;  %v1422_v62 = vpop.f32.mrf.mxu1  ;;  %v1262_v30 = vadd.f32 %v3134_v18, %v1221_v63 }
 0x1df   : > { %v1382_v35 = vadd.f32 %v1381_v24, %v1341_v58 }
 0x1e0   : > { %1863 = vst [vmem:[#allocation2 + $0x8] sm:$0xff] %v1847_v40  ;;  %v1303_v27 = vadd.f32 %v3156_v7, %v1262_v30 }
 0x1e1   : > { %v1460_v41 = vpop.f32.mrf.mxu2  ;;  %v1501_v8 = vpop.f32.mrf.mxu3  ;;  %1708 = vmatmul.f32.gmra.mxu0 %v3427_v25  ;;  %1749 = vmatmul.f32.gmra.mxu1 %v3428_v26  ;;  %v1423_v45 = vadd.f32 %v1422_v62, %v1382_v35 }
 0x1e2   : > { %v1461_v38 = vadd.f32 %v1460_v41, %v1420_v11  ;;  %v1344_v7 = vadd.f32 %v3158_v34, %v1303_v27 }
 0x1e4   : > { %v3233_v39 = vadd.f32 %v1501_v8, %v1461_v38 }
 0x1e6   : > { %v1849_v42 = vmax.f32 %v3233_v39, 0.0  ;;  %1790 = vmatmul.f32.gmra.mxu2 %v3429_v28  ;;  %1831 = vmatmul.f32.gmra.mxu3 %v3430_v33  ;;  %v1384_v51 = vpop.f32.mrf.mxu0  ;;  %v1425_v36 = vpop.f32.mrf.mxu1 }
 0x1e7   : > { %v1385_v54 = vadd.f32 %v1384_v51, %v1344_v7 }
 0x1e8   : > { %1865 = vst [vmem:[#allocation2 + $0x40] sm:$0xff] %v1849_v42 }
 0x1e9   : > { %v1463_v52 = vpop.f32.mrf.mxu2  ;;  %v1504_v18 = vpop.f32.mrf.mxu3  ;;  %1711 = vmatmul.f32.gmra.mxu0 %v3431_v49  ;;  %1752 = vmatmul.f32.gmra.mxu1 %v3432_v1  ;;  %v1426_v46 = vadd.f32 %v1425_v36, %v1385_v54 }
 0x1ea   : > { %v1464_v53 = vadd.f32 %v1463_v52, %v1423_v45  ;;  %v3279_v52 = vperm.slane %v3137_v19, 1 }
 0x1ec   : > { %v3245_v55 = vadd.f32 %v1504_v18, %v1464_v53 }
 0x1ee   : > { %v1851_v20 = vmax.f32 %v3245_v55, 0.0  ;;  %1793 = vmatmul.f32.gmra.mxu2 %v3433_v21  ;;  %1834 = vmatmul.f32.gmra.mxu3 %v3434_v57  ;;  %v1387_v3 = vpop.f32.mrf.mxu0  ;;  %v1428_v48 = vpop.f32.mrf.mxu1 }
 0x1ef   : > { %v1388_v17 = vadd.f32 %v1387_v3, %v1347_v13 }
 0x1f0   : > { %1867 = vst [vmem:[#allocation2 + $0x10] sm:$0xff] %v1851_v20 }
 0x1f1   : > { %v1466_v4 = vpop.f32.mrf.mxu2  ;;  %v1507_v34 = vpop.f32.mrf.mxu3  ;;  %1714 = vmatmul.f32.gmra.mxu0 %v3003_v43  ;;  %1755 = vmatmul.f32.gmra.mxu1 %v3435_v31  ;;  %v1429_v32 = vadd.f32 %v1428_v48, %v1388_v17 }
 0x1f2   : > { %v1467_v2 = vadd.f32 %v1466_v4, %v1426_v46 }
 0x1f4   : > { %v3254_v23 = vadd.f32 %v1507_v34, %v1467_v2 }
 0x1f6   : > { %v1853_v59 = vmax.f32 %v3254_v23, 0.0  ;;  %1796 = vmatmul.f32.gmra.mxu2 %v3436_v29  ;;  %1837 = vmatmul.f32.gmra.mxu3 %v3437_v15  ;;  %v1530_v16 = vpop.f32.mrf.mxu0  ;;  %v1571_v6 = vpop.f32.mrf.mxu1 }
 0x1f7   : > { %v1531_v1 = vadd.f32 %v1530_v16, %v3279_v52 }
 0x1f8   : > { %1869 = vst [vmem:[#allocation2 + $0x60] sm:$0xff] %v1853_v59 }
 0x1f9   : > { %v1469_v60 = vpop.f32.mrf.mxu2  ;;  %v1510_v43 = vpop.f32.mrf.mxu3  ;;  %v1572_v47 = vadd.f32 %v1571_v6, %v1531_v1 }
 0x1fa   : > { %v1470_v9 = vadd.f32 %v1469_v60, %v1429_v32 }
 0x1fc   : > { %v3259_v5 = vadd.f32 %v1510_v43, %v1470_v9 }
 0x1fe   : > { %v1855_v0 = vmax.f32 %v3259_v5, 0.0  ;;  %v1533_v44 = vpop.f32.mrf.mxu0  ;;  %v1574_v37 = vpop.f32.mrf.mxu1 }
 0x1ff   : > { %v1534_v21 = vadd.f32 %v1533_v44, %v3279_v52 }
 0x200   : > { %1871 = vst [vmem:[#allocation2 + $0x78] sm:$0xff] %v1855_v0 }
 0x201   : > { %v1612_v10 = vpop.f32.mrf.mxu2  ;;  %v1653_v40 = vpop.f32.mrf.mxu3  ;;  %v1575_v48 = vadd.f32 %v1574_v37, %v1534_v21 }
 0x202   : > { %v1613_v54 = vadd.f32 %v1612_v10, %v1572_v47 }
 0x204   : > { %v1654_v3 = vadd.f32 %v1653_v40, %v1613_v54 }
 0x206   : > { %v1536_v24 = vpop.f32.mrf.mxu0  ;;  %v1577_v62 = vpop.f32.mrf.mxu1 }
 0x207   : > { %v1537_v13 = vadd.f32 %v1536_v24, %v3279_v52 }
 0x209   : > { %v1615_v63 = vpop.f32.mrf.mxu2  ;;  %v1656_v11 = vpop.f32.mrf.mxu3  ;;  %v1578_v16 = vadd.f32 %v1577_v62, %v1537_v13 }
 0x20a   : > { %v1616_v4 = vadd.f32 %v1615_v63, %v1575_v48 }
 0x20c   : > { %v1657_v29 = vadd.f32 %v1656_v11, %v1616_v4 }
 0x20e   : > { %v1539_v41 = vpop.f32.mrf.mxu0  ;;  %v1580_v8 = vpop.f32.mrf.mxu1 }
 0x20f   : > { %v1540_v44 = vadd.f32 %v1539_v41, %v3279_v52 }
 0x211   : > { %v1618_v25 = vpop.f32.mrf.mxu2  ;;  %v1659_v26 = vpop.f32.mrf.mxu3  ;;  %v1581_v1 = vadd.f32 %v1580_v8, %v1540_v44 }
 0x212   : > { %v1619_v60 = vadd.f32 %v1618_v25, %v1578_v16 }
 0x214   : > { %v1660_v24 = vadd.f32 %v1659_v26, %v1619_v60 }
 0x216   : > { %v1542_v58 = vpop.f32.mrf.mxu0  ;;  %v3262_v38 = vpop.f32.mrf.mxu1 }
 0x219   : > { %v1621_v30 = vpop.f32.mrf.mxu2  ;;  %v1662_v35 = vpop.f32.mrf.mxu3 }
 0x21a   : > { %v1622_v62 = vadd.f32 %v1621_v30, %v1581_v1 }
 0x21c   : > { %v1663_v48 = vadd.f32 %v1662_v35, %v1622_v62 }
 0x21e   : > { %v3264_v27 = vpop.f32.mrf.mxu0  ;;  %v3266_v42 = vpop.f32.mrf.mxu1 }
 0x21f   : > { %v1546_v13 = vadd.f32 %v3264_v27, %v3279_v52 }
 0x221   : > { %v1624_v28 = vpop.f32.mrf.mxu2  ;;  %v3268_v33 = vpop.f32.mrf.mxu3 }
 0x226   : > { %v3270_v51 = vpop.f32.mrf.mxu0  ;;  %v3272_v36 = vpop.f32.mrf.mxu1 }
 0x229   : > { %v3274_v22 = vpop.f32.mrf.mxu2  ;;  %v3276_v45 = vpop.f32.mrf.mxu3 }
 0x22e   : > { %v3281_v18 = vpop.f32.mrf.mxu0  ;;  %v3283_v49 = vpop.f32.mrf.mxu1 }
 0x22f   : > { %v1552_v1 = vadd.f32 %v3281_v18, %v3279_v52 }
 0x231   : > { %v3286_v7 = vpop.f32.mrf.mxu2  ;;  %v3288_v53 = vpop.f32.mrf.mxu3 }
 0x236   : > { %v1694_v56 = vpop.f32.mrf.mxu0  ;;  %v1735_v20 = vpop.f32.mrf.mxu1 }
 0x237   : > { %v1695_v46 = vadd.f32 %v1694_v56, %v1654_v3 }
 0x239   : > { %v3291_v57 = vpop.f32.mrf.mxu2  ;;  %v3293_v19 = vpop.f32.mrf.mxu3  ;;  %v1736_v2 = vadd.f32 %v1735_v20, %v1695_v46  ;;  %v1543_v20 = vadd.f32 %v1542_v58, %v3279_v52 }
 0x23b   : > { %v1584_v26 = vadd.f32 %v3262_v38, %v1543_v20  ;;  %v1587_v38 = vadd.f32 %v3266_v42, %v1546_v13 }
 0x23e   : > { %v1697_v34 = vpop.f32.mrf.mxu0  ;;  %v1738_v31 = vpop.f32.mrf.mxu1 }
 0x23f   : > { %v1698_v6 = vadd.f32 %v1697_v34, %v1657_v29  ;;  %v1625_v34 = vadd.f32 %v1624_v28, %v1584_v26  ;;  %v1628_v28 = vadd.f32 %v3274_v22, %v1587_v38 }
 0x241   : > { %v1776_v17 = vpop.f32.mrf.mxu2  ;;  %v1817_v59 = vpop.f32.mrf.mxu3  ;;  %v1739_v37 = vadd.f32 %v1738_v31, %v1698_v6  ;;  %v1666_v35 = vadd.f32 %v3268_v33, %v1625_v34  ;;  %v1669_v44 = vadd.f32 %v3276_v45, %v1628_v28 }
 0x242   : > { %v1777_v15 = vadd.f32 %v1776_v17, %v1736_v2 }
 0x244   : > { %v3296_v32 = vadd.f32 %v1817_v59, %v1777_v15 }
 0x246   : > { %v1842_v43 = vmax.f32 %v3296_v32, 0.0  ;;  %v1700_v9 = vpop.f32.mrf.mxu0  ;;  %v1741_v0 = vpop.f32.mrf.mxu1 }
 0x247   : > { %v1701_v11 = vadd.f32 %v1700_v9, %v1660_v24 }
 0x248   : > { %1858 = vst [vmem:[#allocation2] sm:$0xff] %v1842_v43  ;;  %v1549_v43 = vadd.f32 %v3270_v51, %v3279_v52 }
 0x249   : > { %v1779_v10 = vpop.f32.mrf.mxu2  ;;  %v1820_v40 = vpop.f32.mrf.mxu3  ;;  %v1742_v21 = vadd.f32 %v1741_v0, %v1701_v11 }
 0x24a   : > { %v1780_v63 = vadd.f32 %v1779_v10, %v1739_v37  ;;  %v1590_v10 = vadd.f32 %v3272_v36, %v1549_v43 }
 0x24c   : > { %v3300_v47 = vadd.f32 %v1820_v40, %v1780_v63  ;;  %v1631_v24 = vadd.f32 %v3286_v7, %v1590_v10 }
 0x24e   : > { %v1844_v54 = vmax.f32 %v3300_v47, 0.0  ;;  %v1703_v25 = vpop.f32.mrf.mxu0  ;;  %v1744_v56 = vpop.f32.mrf.mxu1 }
 0x24f   : > { %v1704_v4 = vadd.f32 %v1703_v25, %v1663_v48  ;;  %v1593_v25 = vadd.f32 %v3283_v49, %v1552_v1 }
 0x250   : > { %1860 = vst [vmem:[#allocation2 + $0x18] sm:$0xff] %v1844_v54  ;;  %v1672_v54 = vadd.f32 %v3288_v53, %v1631_v24 }
 0x251   : > { %v1782_v41 = vpop.f32.mrf.mxu2  ;;  %v1823_v3 = vpop.f32.mrf.mxu3  ;;  %v1745_v2 = vadd.f32 %v1744_v56, %v1704_v4 }
 0x252   : > { %v1783_v46 = vadd.f32 %v1782_v41, %v1742_v21  ;;  %v1634_v21 = vadd.f32 %v3291_v57, %v1593_v25 }
 0x254   : > { %v3305_v8 = vadd.f32 %v1823_v3, %v1783_v46  ;;  %v1675_v18 = vadd.f32 %v3293_v19, %v1634_v21 }
 0x256   : > { %v1846_v30 = vmax.f32 %v3305_v8, 0.0  ;;  %v1706_v31 = vpop.f32.mrf.mxu0  ;;  %v1747_v58 = vpop.f32.mrf.mxu1 }
 0x257   : > { %v1707_v15 = vadd.f32 %v1706_v31, %v1666_v35 }
 0x258   : > { %1862 = vst [vmem:[#allocation2 + $0x68] sm:$0xff] %v1846_v30 }
 0x259   : > { %v1785_v17 = vpop.f32.mrf.mxu2  ;;  %v1826_v59 = vpop.f32.mrf.mxu3  ;;  %v1748_v27 = vadd.f32 %v1747_v58, %v1707_v15 }
 0x25a   : > { %v1786_v29 = vadd.f32 %v1785_v17, %v1745_v2 }
 0x25c   : > { %v1827_v16 = vadd.f32 %v1826_v59, %v1786_v29 }
 0x25e   : > { %v1848_v6 = vmax.f32 %v1827_v16, 0.0  ;;  %v1709_v60 = vpop.f32.mrf.mxu0  ;;  %v1750_v33 = vpop.f32.mrf.mxu1 }
 0x25f   : > { %v1710_v42 = vadd.f32 %v1709_v60, %v1669_v44 }
 0x260   : > { %1864 = vst [vmem:[#allocation2 + $0x48] sm:$0xff] %v1848_v6 }
 0x261   : > { %v1788_v9 = vpop.f32.mrf.mxu2  ;;  %v1829_v0 = vpop.f32.mrf.mxu3  ;;  %v1751_v51 = vadd.f32 %v1750_v33, %v1710_v42 }
 0x262   : > { %v1789_v37 = vadd.f32 %v1788_v9, %v1748_v27 }
 0x264   : > { %v1830_v40 = vadd.f32 %v1829_v0, %v1789_v37 }
 0x266   : > { %v1850_v22 = vmax.f32 %v1830_v40, 0.0  ;;  %v1712_v63 = vpop.f32.mrf.mxu0  ;;  %v1753_v20 = vpop.f32.mrf.mxu1 }
 0x267   : > { %v1713_v56 = vadd.f32 %v1712_v63, %v1672_v54 }
 0x268   : > { %1866 = vst [vmem:[#allocation2 + $0x20] sm:$0xff] %v1850_v22 }
 0x269   : > { %v1791_v11 = vpop.f32.mrf.mxu2  ;;  %v1832_v62 = vpop.f32.mrf.mxu3  ;;  %v1754_v41 = vadd.f32 %v1753_v20, %v1713_v56 }
 0x26a   : > { %v1792_v45 = vadd.f32 %v1791_v11, %v1751_v51 }
 0x26c   : > { %v1833_v36 = vadd.f32 %v1832_v62, %v1792_v45 }
 0x26e   : > { %v1852_v7 = vmax.f32 %v1833_v36, 0.0  ;;  %v1715_v3 = vpop.f32.mrf.mxu0  ;;  %v1756_v34 = vpop.f32.mrf.mxu1 }
 0x26f   : > { %v1716_v26 = vadd.f32 %v1715_v3, %v1675_v18 }
 0x270   : > { %1868 = vst [vmem:[#allocation2 + $0x38] sm:$0xff] %v1852_v7 }
 0x271   : > { %v1794_v48 = vpop.f32.mrf.mxu2  ;;  %v1835_v52 = vpop.f32.mrf.mxu3  ;;  %v1757_v30 = vadd.f32 %v1756_v34, %v1716_v26 }
 0x272   : > { %v1795_v46 = vadd.f32 %v1794_v48, %v1754_v41 }
 0x274   : > { %v1836_v4 = vadd.f32 %v1835_v52, %v1795_v46 }
 0x276   : > { %v1854_v53 = vmax.f32 %v1836_v4, 0.0 }
 0x278   : > { %1870 = vst [vmem:[#allocation2 + $0x70] sm:$0xff] %v1854_v53 }
 0x279   : > { %v1797_v49 = vpop.f32.mrf.mxu2  ;;  %v1838_v13 = vpop.f32.mrf.mxu3 }
 0x27a   : > { %v1798_v31 = vadd.f32 %v1797_v49, %v1757_v30 }
 0x27c   : > { %v1839_v2 = vadd.f32 %v1838_v13, %v1798_v31  ;;  %1876 = sbr.rel (%p2095_p7) target bundleno = 664 (0x298), region = 56 }
 0x27e   : > { %v1856_v57 = vmax.f32 %v1839_v2, 0.0 }
 0x280   : > { %1872 = vst [vmem:[#allocation2 + $0x28] sm:$0xff] %v1856_v57 }
 0x281   : > { %2153 = vtanh.f32 %v3185_v12 }
 0x282   : > { %2155 = vtanh.f32 %v3296_v32 }
 0x283   : > { %2157 = vtanh.f32 %v3197_v50 }
 0x284   : > { %2159 = vtanh.f32 %v3300_v47 }
 0x285   : > { %2161 = vtanh.f32 %v3209_v14 }
 0x286   : > { %2163 = vtanh.f32 %v3305_v8 }
 0x287   : > { %v2154_v19 = vpop.eup %2153  ;;  %2165 = vtanh.f32 %v3221_v61 }
 0x288   : > { %v2156_v58 = vpop.eup %2155  ;;  %1893 = vst [vmem:[%s3401_s4] sm:$0xff] %v2154_v19  ;;  %2167 = vtanh.f32 %v1827_v16 }
 0x289   : > { %v2158_v12 = vpop.eup %2157  ;;  %1894 = vst [vmem:[%s3401_s4 + $0x8] sm:$0xff] %v2156_v58  ;;  %2169 = vtanh.f32 %v3233_v39 }
 0x28a   : > { %v2160_v50 = vpop.eup %2159  ;;  %1895 = vst [vmem:[%s3401_s4 + $0x10] sm:$0xff] %v2158_v12  ;;  %2171 = vtanh.f32 %v1830_v40 }
 0x28b   : > { %v2162_v14 = vpop.eup %2161  ;;  %1896 = vst [vmem:[%s3401_s4 + $0x18] sm:$0xff] %v2160_v50  ;;  %2173 = vtanh.f32 %v3245_v55 }
 0x28c   : > { %v2164_v61 = vpop.eup %2163  ;;  %1897 = vst [vmem:[%s3401_s4 + $0x20] sm:$0xff] %v2162_v14  ;;  %2175 = vtanh.f32 %v1833_v36 }
 0x28d   : > { %v2166_v39 = vpop.eup %2165  ;;  %1898 = vst [vmem:[%s3401_s4 + $0x28] sm:$0xff] %v2164_v61  ;;  %2177 = vtanh.f32 %v3254_v23 }
 0x28e   : > { %v2168_v32 = vpop.eup %2167  ;;  %1899 = vst [vmem:[%s3401_s4 + $0x30] sm:$0xff] %v2166_v39  ;;  %2179 = vtanh.f32 %v1836_v4 }
 0x28f   : > { %v2170_v55 = vpop.eup %2169  ;;  %1900 = vst [vmem:[%s3401_s4 + $0x38] sm:$0xff] %v2168_v32  ;;  %2181 = vtanh.f32 %v3259_v5 }
 0x290   : > { %v2172_v47 = vpop.eup %2171  ;;  %1901 = vst [vmem:[%s3401_s4 + $0x40] sm:$0xff] %v2170_v55  ;;  %2183 = vtanh.f32 %v1839_v2 }
 0x291   : > { %v2174_v23 = vpop.eup %2173  ;;  %1902 = vst [vmem:[%s3401_s4 + $0x48] sm:$0xff] %v2172_v47 }
 0x292   : > { %v2176_v8 = vpop.eup %2175  ;;  %1903 = vst [vmem:[%s3401_s4 + $0x50] sm:$0xff] %v2174_v23 }
 0x293   : > { %v2178_v17 = vpop.eup %2177  ;;  %1904 = vst [vmem:[%s3401_s4 + $0x58] sm:$0xff] %v2176_v8 }
 0x294   : > { %v2180_v5 = vpop.eup %2179  ;;  %1905 = vst [vmem:[%s3401_s4 + $0x60] sm:$0xff] %v2178_v17 }
 0x295   : > { %v2182_v59 = vpop.eup %2181  ;;  %1906 = vst [vmem:[%s3401_s4 + $0x68] sm:$0xff] %v2180_v5 }
 0x296   : > { %v2184_v35 = vpop.eup %2183  ;;  %1907 = vst [vmem:[%s3401_s4 + $0x70] sm:$0xff] %v2182_v59 }
 0x297   : > { %1908 = vst [vmem:[%s3401_s4 + $0x78] sm:$0xff] %v2184_v35 }
 0x298 PF: > { %p17_p10 = scmp.ge.s32.totalorder %s2366_s20, 10   ;;  %s3438_s15 = smov %s2305_s16 }
 0x299   : > { %s3439_s16 = smov %s2309_s17  ;;  %s3440_s17 = smov %s2376_s23 }
 0x29a   : > { %s3441_s18 = smov %s2366_s20  ;;  %19 = sbr.rel (!%p17_p10) target bundleno = 5 (0x5), region = 107 }
 0x29f   :  { %1920 = vsyncpa [#allocation5], 1 }
 0x2a0   :  { %1922 = vsyncpa [#allocation5 + $0x1], 1 }
 0x2a1   :  { %1923 = vsyncpa [#allocation7], 1 }
 0x2a2   :  { %1925 = vsyncpa [#allocation7 + $0x1], 1 }

</bundles_post_ra>
